<compile_context>
chip_gen: v7x
topology: tpu7x:2x2x1
jax: 0.10.0
libtpu: 0.0.40
codegen_flags: <defaults>
</compile_context>

<pallas_src>
import math

import jax
import jax.numpy as jnp
from jax.experimental import pallas as pl
from jax.experimental.pallas import tpu as pltpu


_PARALLEL_B = pltpu.CompilerParams(dimension_semantics=("parallel",))


# ----------------------------------------------------------------------------
# The single fused kernel (whole network, one batch element per grid step)
# ----------------------------------------------------------------------------
def _make_fused_kernel(*, T, dilation, J, metas):
    """features Linear -> depth x InceptionModulePlus (+ residuals) -> 1x1 head."""
    pad = (J - 1) * dilation

    def kernel(*refs):
        it = iter(refs)
        x_ref = next(it)                       # (1, T, in_feats)
        fw_ref = next(it)                      # (in_feats, layer_size)
        fb_ref = next(it)                      # (1, layer_size)
        mod_refs = []
        for meta in metas:
            mr = {}
            if meta["has_bottleneck"]:
                mr["bneck"] = next(it)         # (ni, nf)
            mr["wbig"] = next(it)              # (J*conv_in + ni, 4*nf) merged
            mr["scale"] = next(it)             # (1, 4*nf) eval-BN scale
            mr["shift"] = next(it)             # (1, 4*nf) eval-BN shift
            if meta["has_residual"]:
                if meta["has_sc_conv"]:
                    mr["sc_w"] = next(it)      # (n_in, 4*nf)
                mr["sc_scale"] = next(it)      # (1, 4*nf)
                mr["sc_shift"] = next(it)      # (1, 4*nf)
            mod_refs.append(mr)
        head_ref = next(it)                    # (4*nf, c_out)
        o_ref = next(it)                       # (1, T, c_out)
        xpad_ref = next(it)                    # (pad + T, max_conv_in)   scratch
        cols_ref = next(it)                    # (T, max_W)               scratch
        mp_ref = next(it)                      # (T + 2, max_ni)          scratch

        # ---- features: nn.Linear(in_feats, layer_size) ----------------------
        h = jnp.dot(x_ref[0], fw_ref[...],
                    preferred_element_type=jnp.float32) + fb_ref[...]   # (T, c_in)
        res = h

        # ---- depth x fused InceptionModulePlus -------------------------------
        for meta, mr in zip(metas, mod_refs):
            ni = meta["ni"]
            conv_in = meta["conv_in"]
            inp = h                                                    # (T, ni)

            # bottleneck 1x1 causal conv
            if meta["has_bottleneck"]:
                xb = jnp.dot(inp, mr["bneck"][...],
                             preferred_element_type=jnp.float32)       # (T, conv_in)
            else:
                xb = inp

            # causal left zero-pad along time, entirely in VMEM
            xpad_ref[0:pad, 0:conv_in] = jnp.zeros((pad, conv_in), jnp.float32)
            xpad_ref[pad:pad + T, 0:conv_in] = xb

            # im2col of ONLY the J taps whose receptive field overlaps real data
            for j in range(J):
                off = pad - j * dilation
                cols_ref[:, j * conv_in:(j + 1) * conv_in] = \
                    xpad_ref[off:off + T, 0:conv_in]

            # MaxPool1d(kernel=3, stride=1, padding=1) branch input
            # (edge-replication is equivalent to the -inf padding for this pool)
            mp_ref[1:T + 1, 0:ni] = inp
            mp_ref[0:1, 0:ni] = inp[0:1, :]
            mp_ref[T + 1:T + 2, 0:ni] = inp[T - 1:T, :]
            pooled = jnp.maximum(
                jnp.maximum(mp_ref[0:T, 0:ni], mp_ref[1:T + 1, 0:ni]),
                mp_ref[2:T + 2, 0:ni])                                 # (T, ni)
            cols_ref[:, J * conv_in:J * conv_in + ni] = pooled

            # single wide contraction: 3 dilated convs + mp-1x1, already in
            # concatenated channel order [conv_k0 | conv_k1 | conv_k2 | mp]
            W = J * conv_in + ni
            hh = jnp.dot(cols_ref[:, 0:W], mr["wbig"][...],
                         preferred_element_type=jnp.float32)           # (T, 4*nf)

            # eval-mode BatchNorm affine + act / residual epilogue
            hh = hh * mr["scale"][...] + mr["shift"][...]
            if meta["has_residual"]:
                if meta["has_sc_conv"]:
                    s = jnp.dot(res, mr["sc_w"][...],
                                preferred_element_type=jnp.float32)
                else:
                    s = res
                s = s * mr["sc_scale"][...] + mr["sc_shift"][...]
                hh = jnp.maximum(hh + s, 0.0)
            elif meta["act"]:
                hh = jnp.maximum(hh, 0.0)

            h = hh
            if meta["has_residual"]:
                res = h

        # ---- fused causal-1x1 head (bias-free) -------------------------------
        o_ref[0] = jnp.dot(h, head_ref[...], preferred_element_type=jnp.float32)

    return kernel


# ----------------------------------------------------------------------------
# Parameter construction (deterministic, synthetic)
# ----------------------------------------------------------------------------
def _uniform(key, shape, fan_in):
    bound = 1.0 / math.sqrt(float(fan_in))
    return jax.random.uniform(key, shape, jnp.float32, -bound, bound)


def init_inrplus2_params(key, in_feats, depth, layer_size, ks=(139, 19, 3)):
    nf = layer_size
    c_in = layer_size  # channels entering the backbone (= features output)
    keys = iter(jax.random.split(key, 16 * depth + 16))

    eps = 1e-5
    bn_scale = lambda C: jnp.full((1, C), 1.0 / math.sqrt(1.0 + eps), jnp.float32)
    bn_shift = lambda C: jnp.zeros((1, C), jnp.float32)

    p = {
        "nf": nf,
        "ks": tuple(ks),
        "feat_w": _uniform(next(keys), (in_feats, layer_size), in_feats),
        "feat_b": _uniform(next(keys), (layer_size,), in_feats),
    }

    modules, shortcuts = [], []
    ni = c_in
    for d in range(depth):
        m = {}
        use_bottleneck = ni != nf  # tsai: bottleneck disabled when ni == nf
        m["bottleneck_w"] = _uniform(next(keys), (ni, nf), ni) if use_bottleneck else None
        conv_in = nf if use_bottleneck else ni
        m["conv_ws"] = [_uniform(next(keys), (k, conv_in, nf), conv_in * k) for k in ks]
        m["mp_conv_w"] = _uniform(next(keys), (ni, nf), ni)
        m["bn_scale"], m["bn_shift"] = bn_scale(4 * nf), bn_shift(4 * nf)
        m["act"] = (d % 3 != 2)  # act deferred to the residual join every 3rd module
        modules.append(m)

        if d % 3 == 2:  # residual shortcut
            n_in = c_in if d == 2 else 4 * nf
            sc = {"conv_w": _uniform(next(keys), (n_in, 4 * nf), n_in) if n_in != 4 * nf else None}
            sc["bn_scale"], sc["bn_shift"] = bn_scale(4 * nf), bn_shift(4 * nf)
            shortcuts.append(sc)
        ni = 4 * nf

    p["modules"] = modules
    p["shortcuts"] = shortcuts
    # custom_head: CausalConv1d(head_nf=4*nf, c_out=layer_size, kernel=1, bias=False)
    p["head_w"] = _uniform(next(keys), (4 * nf, layer_size), 4 * nf)
    return p


def _merge_module_weights(m, ks, J, conv_in, ni, nf):
    """Column-wise merge of the 3 dilated convs (only J effective taps) and the
    maxpool-1x1 conv into one block weight (J*conv_in + ni, 4*nf)."""
    lag_blocks = []
    for j in range(J):
        row = []
        for K, w in zip(ks, m["conv_ws"]):          # w: (K, conv_in, nf)
            if j < K:
                row.append(w[K - 1 - j])            # tap touching x[t - j*dil]
            else:
                row.append(jnp.zeros((conv_in, nf), jnp.float32))
        lag_blocks.append(jnp.concatenate(row, axis=1))          # (conv_in, 3*nf)
    w_taps = jnp.concatenate(lag_blocks, axis=0)                 # (J*conv_in, 3*nf)
    top = jnp.concatenate(
        [w_taps, jnp.zeros((J * conv_in, nf), jnp.float32)], axis=1)
    bot = jnp.concatenate(
        [jnp.zeros((ni, 3 * nf), jnp.float32), m["mp_conv_w"]], axis=1)
    return jnp.concatenate([top, bot], axis=0)                   # (J*conv_in+ni, 4*nf)


def prepare_inrplus2(params, T, dilation):
    """Merge/flatten all weights ONCE into the pallas_call input list + metas."""
    nf = params["nf"]
    ks = params["ks"]
    # only taps whose receptive field overlaps real data (skip all-zero pad taps)
    J = min(max(ks), (T - 1) // dilation + 1)
    c_in = params["feat_w"].shape[1]

    flat = [params["feat_w"], params["feat_b"].reshape(1, -1)]
    metas = []
    ni = c_in
    sc_i = 0
    for d, m in enumerate(params["modules"]):
        has_bottleneck = m["bottleneck_w"] is not None
        conv_in = nf if has_bottleneck else ni
        is_res = (d % 3 == 2)
        meta = {"ni": ni, "conv_in": conv_in, "has_bottleneck": has_bottleneck,
                "has_residual": is_res, "has_sc_conv": False, "act": m["act"]}
        if has_bottleneck:
            flat.append(m["bottleneck_w"])
        flat.append(_merge_module_weights(m, ks, J, conv_in, ni, nf))
        flat += [m["bn_scale"], m["bn_shift"]]
        if is_res:
            sc = params["shortcuts"][sc_i]
            sc_i += 1
            meta["has_sc_conv"] = sc["conv_w"] is not None
            if meta["has_sc_conv"]:
                flat.append(sc["conv_w"])
            flat += [sc["bn_scale"], sc["bn_shift"]]
        metas.append(meta)
        ni = 4 * nf
    flat.append(params["head_w"])
    return flat, metas, J


# ----------------------------------------------------------------------------
# Forward pass: ONE fused pallas_call (grid over batch)
# ----------------------------------------------------------------------------
def inrplus2_forward(params, x, dilation=2):
    # x: [B, S, in_feats]  ->  [B, S, layer_size]
    B, T, in_feats = x.shape
    flat, metas, J = prepare_inrplus2(params, T, dilation)
    pad = (J - 1) * dilation
    c_out = params["head_w"].shape[1]

    max_conv_in = max(m["conv_in"] for m in metas)
    max_ni = max(m["ni"] for m in metas)
    max_w = max(J * m["conv_in"] + m["ni"] for m in metas)

    in_specs = [pl.BlockSpec((1, T, in_feats), lambda i: (i, 0, 0))]
    for w in flat:  # all weights are 2-D, full-extent blocks, DMA'd once
        in_specs.append(pl.BlockSpec(w.shape, lambda i: (0, 0)))

    kern = _make_fused_kernel(T=T, dilation=dilation, J=J, metas=metas)

    return pl.pallas_call(
        kern,
        out_shape=jax.ShapeDtypeStruct((B, T, c_out), jnp.float32),
        grid=(B,),
        in_specs=in_specs,
        out_specs=pl.BlockSpec((1, T, c_out), lambda i: (i, 0, 0)),
        scratch_shapes=[
            pltpu.VMEM((pad + T, max_conv_in), jnp.float32),   # causal-padded x
            pltpu.VMEM((T, max_w), jnp.float32),               # merged im2col operand
            pltpu.VMEM((T + 2, max_ni), jnp.float32),          # maxpool window
        ],
        compiler_params=_PARALLEL_B,
    )(x, *flat)
    # (torch permute((0,2,1)) before/after the backbone are layout no-ops here)


# ----------------------------------------------------------------------------
if __name__ == "__main__":
    B, S, in_feats = 2, 16, 4
    layers, layer_size = 3, 16     # depth=3, nf=c_out=16

    key = jax.random.PRNGKey(0)
    pkey, xkey = jax.random.split(key)
    params = init_inrplus2_params(pkey, in_feats, layers, layer_size)
    x = jax.random.normal(xkey, (B, S, in_feats), jnp.float32)

    out = inrplus2_forward(params, x, dilation=2)
    out = jax.block_until_ready(out)
    assert out.shape == (B, S, layer_size), out.shape
    assert bool(jnp.all(jnp.isfinite(out)))
    print("KERNEL_OK")
</pallas_src>

<mosaic_0001>
module attributes {stable_mosaic.version = 11 : i64} {
  func.func @kernel(%arg0: i32, %arg1: memref<1x16x4xf32, #tpu.memory_space<vmem>>, %arg2: memref<4x16xf32, #tpu.memory_space<vmem>>, %arg3: memref<1x16xf32, #tpu.memory_space<vmem>>, %arg4: memref<144x64xf32, #tpu.memory_space<vmem>>, %arg5: memref<1x64xf32, #tpu.memory_space<vmem>>, %arg6: memref<1x64xf32, #tpu.memory_space<vmem>>, %arg7: memref<64x16xf32, #tpu.memory_space<vmem>>, %arg8: memref<192x64xf32, #tpu.memory_space<vmem>>, %arg9: memref<1x64xf32, #tpu.memory_space<vmem>>, %arg10: memref<1x64xf32, #tpu.memory_space<vmem>>, %arg11: memref<64x16xf32, #tpu.memory_space<vmem>>, %arg12: memref<192x64xf32, #tpu.memory_space<vmem>>, %arg13: memref<1x64xf32, #tpu.memory_space<vmem>>, %arg14: memref<1x64xf32, #tpu.memory_space<vmem>>, %arg15: memref<16x64xf32, #tpu.memory_space<vmem>>, %arg16: memref<1x64xf32, #tpu.memory_space<vmem>>, %arg17: memref<1x64xf32, #tpu.memory_space<vmem>>, %arg18: memref<64x16xf32, #tpu.memory_space<vmem>>, %arg19: memref<1x16x16xf32, #tpu.memory_space<vmem>>, %arg20: memref<30x16xf32, #tpu.memory_space<vmem>>, %arg21: memref<16x192xf32, #tpu.memory_space<vmem>>, %arg22: memref<18x64xf32, #tpu.memory_space<vmem>>) attributes {dimension_semantics = [#tpu.dimension_semantics<parallel>], iteration_bounds = array<i64: 2>, scalar_prefetch = 0 : i64, scratch_operands = 3 : i64, tpu.core_type = #tpu.core_type<tc>, window_params = [{transform_indices = @transform_0, window_bounds = array<i64: 1, 16, 4>}, {pipeline_mode = #tpu.pipeline_mode<synchronous>, transform_indices = @transform_1, window_bounds = array<i64: 4, 16>}, {pipeline_mode = #tpu.pipeline_mode<synchronous>, transform_indices = @transform_2, window_bounds = array<i64: 1, 16>}, {pipeline_mode = #tpu.pipeline_mode<synchronous>, transform_indices = @transform_3, window_bounds = array<i64: 144, 64>}, {pipeline_mode = #tpu.pipeline_mode<synchronous>, transform_indices = @transform_4, window_bounds = array<i64: 1, 64>}, {pipeline_mode = #tpu.pipeline_mode<synchronous>, transform_indices = @transform_5, window_bounds = array<i64: 1, 64>}, {pipeline_mode = #tpu.pipeline_mode<synchronous>, transform_indices = @transform_6, window_bounds = array<i64: 64, 16>}, {pipeline_mode = #tpu.pipeline_mode<synchronous>, transform_indices = @transform_7, window_bounds = array<i64: 192, 64>}, {pipeline_mode = #tpu.pipeline_mode<synchronous>, transform_indices = @transform_8, window_bounds = array<i64: 1, 64>}, {pipeline_mode = #tpu.pipeline_mode<synchronous>, transform_indices = @transform_9, window_bounds = array<i64: 1, 64>}, {pipeline_mode = #tpu.pipeline_mode<synchronous>, transform_indices = @transform_10, window_bounds = array<i64: 64, 16>}, {pipeline_mode = #tpu.pipeline_mode<synchronous>, transform_indices = @transform_11, window_bounds = array<i64: 192, 64>}, {pipeline_mode = #tpu.pipeline_mode<synchronous>, transform_indices = @transform_12, window_bounds = array<i64: 1, 64>}, {pipeline_mode = #tpu.pipeline_mode<synchronous>, transform_indices = @transform_13, window_bounds = array<i64: 1, 64>}, {pipeline_mode = #tpu.pipeline_mode<synchronous>, transform_indices = @transform_14, window_bounds = array<i64: 16, 64>}, {pipeline_mode = #tpu.pipeline_mode<synchronous>, transform_indices = @transform_15, window_bounds = array<i64: 1, 64>}, {pipeline_mode = #tpu.pipeline_mode<synchronous>, transform_indices = @transform_16, window_bounds = array<i64: 1, 64>}, {pipeline_mode = #tpu.pipeline_mode<synchronous>, transform_indices = @transform_17, window_bounds = array<i64: 64, 16>}, {transform_indices = @transform_18, window_bounds = array<i64: 1, 16, 16>}]} {
    %c0 = arith.constant 0 : index
    %c0_0 = arith.constant 0 : index
    %c0_1 = arith.constant 0 : index
    %0 = vector.load %arg1[%c0, %c0_0, %c0_1] : memref<1x16x4xf32, #tpu.memory_space<vmem>>, vector<1x16x4xf32>
    %1 = vector.shape_cast %0 : vector<1x16x4xf32> to vector<16x4xf32>
    %c0_2 = arith.constant 0 : index
    %c0_3 = arith.constant 0 : index
    %2 = vector.load %arg2[%c0_2, %c0_3] : memref<4x16xf32, #tpu.memory_space<vmem>>, vector<4x16xf32>
    %cst = arith.constant dense<0.000000e+00> : vector<16x16xf32>
    %3 = tpu.matmul %1, %2, %cst {dimension_numbers = #tpu.dot_dimension_numbers<[1], [0], [0], [1], [0, 0, 1, 1], [], []>} : vector<16x4xf32>, vector<4x16xf32>, vector<16x16xf32> -> vector<16x16xf32>
    %c0_4 = arith.constant 0 : index
    %c0_5 = arith.constant 0 : index
    %4 = vector.load %arg3[%c0_4, %c0_5] : memref<1x16xf32, #tpu.memory_space<vmem>>, vector<1x16xf32>
    %5 = vector.broadcast %4 : vector<1x16xf32> to vector<16x16xf32>
    %6 = arith.addf %3, %5 : vector<16x16xf32>
    %cst_6 = arith.constant 0.000000e+00 : f32
    %7 = vector.broadcast %cst_6 : f32 to vector<14x16xf32>
    %c0_7 = arith.constant 0 : index
    %c0_8 = arith.constant 0 : index
    %8 = vector.load %arg20[%c0_7, %c0_8] : memref<30x16xf32, #tpu.memory_space<vmem>>, vector<14x16xf32>
    tpu.vector_store %arg20[%c0_7, %c0_8], %7 {strides = array<i32>} : memref<30x16xf32, #tpu.memory_space<vmem>>, vector<14x16xf32>,
    %c14 = arith.constant 14 : index
    %c0_9 = arith.constant 0 : index
    %9 = vector.load %arg20[%c14, %c0_9] : memref<30x16xf32, #tpu.memory_space<vmem>>, vector<16x16xf32>
    tpu.vector_store %arg20[%c14, %c0_9], %6 {strides = array<i32>} : memref<30x16xf32, #tpu.memory_space<vmem>>, vector<16x16xf32>,
    %c14_10 = arith.constant 14 : index
    %c0_11 = arith.constant 0 : index
    %10 = vector.load %arg20[%c14_10, %c0_11] : memref<30x16xf32, #tpu.memory_space<vmem>>, vector<16x16xf32>
    %c0_12 = arith.constant 0 : index
    %c0_13 = arith.constant 0 : index
    %11 = vector.load %arg21[%c0_12, %c0_13] : memref<16x192xf32, #tpu.memory_space<vmem>>, vector<16x16xf32>
    tpu.vector_store %arg21[%c0_12, %c0_13], %10 {strides = array<i32>} : memref<16x192xf32, #tpu.memory_space<vmem>>, vector<16x16xf32>,
    %c12 = arith.constant 12 : index
    %c0_14 = arith.constant 0 : index
    %12 = vector.load %arg20[%c12, %c0_14] : memref<30x16xf32, #tpu.memory_space<vmem>>, vector<16x16xf32>
    %c0_15 = arith.constant 0 : index
    %c16 = arith.constant 16 : index
    %13 = vector.load %arg21[%c0_15, %c16] : memref<16x192xf32, #tpu.memory_space<vmem>>, vector<16x16xf32>
    tpu.vector_store %arg21[%c0_15, %c16], %12 {strides = array<i32>} : memref<16x192xf32, #tpu.memory_space<vmem>>, vector<16x16xf32>,
    %c10 = arith.constant 10 : index
    %c0_16 = arith.constant 0 : index
    %14 = vector.load %arg20[%c10, %c0_16] : memref<30x16xf32, #tpu.memory_space<vmem>>, vector<16x16xf32>
    %c0_17 = arith.constant 0 : index
    %c32 = arith.constant 32 : index
    %15 = vector.load %arg21[%c0_17, %c32] : memref<16x192xf32, #tpu.memory_space<vmem>>, vector<16x16xf32>
    tpu.vector_store %arg21[%c0_17, %c32], %14 {strides = array<i32>} : memref<16x192xf32, #tpu.memory_space<vmem>>, vector<16x16xf32>,
    %c8 = arith.constant 8 : index
    %c0_18 = arith.constant 0 : index
    %16 = vector.load %arg20[%c8, %c0_18] : memref<30x16xf32, #tpu.memory_space<vmem>>, vector<16x16xf32>
    %c0_19 = arith.constant 0 : index
    %c48 = arith.constant 48 : index
    %17 = vector.load %arg21[%c0_19, %c48] : memref<16x192xf32, #tpu.memory_space<vmem>>, vector<16x16xf32>
    tpu.vector_store %arg21[%c0_19, %c48], %16 {strides = array<i32>} : memref<16x192xf32, #tpu.memory_space<vmem>>, vector<16x16xf32>,
    %c6 = arith.constant 6 : index
    %c0_20 = arith.constant 0 : index
    %18 = vector.load %arg20[%c6, %c0_20] : memref<30x16xf32, #tpu.memory_space<vmem>>, vector<16x16xf32>
    %c0_21 = arith.constant 0 : index
    %c64 = arith.constant 64 : index
    %19 = vector.load %arg21[%c0_21, %c64] : memref<16x192xf32, #tpu.memory_space<vmem>>, vector<16x16xf32>
    tpu.vector_store %arg21[%c0_21, %c64], %18 {strides = array<i32>} : memref<16x192xf32, #tpu.memory_space<vmem>>, vector<16x16xf32>,
    %c4 = arith.constant 4 : index
    %c0_22 = arith.constant 0 : index
    %20 = vector.load %arg20[%c4, %c0_22] : memref<30x16xf32, #tpu.memory_space<vmem>>, vector<16x16xf32>
    %c0_23 = arith.constant 0 : index
    %c80 = arith.constant 80 : index
    %21 = vector.load %arg21[%c0_23, %c80] : memref<16x192xf32, #tpu.memory_space<vmem>>, vector<16x16xf32>
    tpu.vector_store %arg21[%c0_23, %c80], %20 {strides = array<i32>} : memref<16x192xf32, #tpu.memory_space<vmem>>, vector<16x16xf32>,
    %c2 = arith.constant 2 : index
    %c0_24 = arith.constant 0 : index
    %22 = vector.load %arg20[%c2, %c0_24] : memref<30x16xf32, #tpu.memory_space<vmem>>, vector<16x16xf32>
    %c0_25 = arith.constant 0 : index
    %c96 = arith.constant 96 : index
    %23 = vector.load %arg21[%c0_25, %c96] : memref<16x192xf32, #tpu.memory_space<vmem>>, vector<16x16xf32>
    tpu.vector_store %arg21[%c0_25, %c96], %22 {strides = array<i32>} : memref<16x192xf32, #tpu.memory_space<vmem>>, vector<16x16xf32>,
    %c0_26 = arith.constant 0 : index
    %c0_27 = arith.constant 0 : index
    %24 = vector.load %arg20[%c0_26, %c0_27] : memref<30x16xf32, #tpu.memory_space<vmem>>, vector<16x16xf32>
    %c0_28 = arith.constant 0 : index
    %c112 = arith.constant 112 : index
    %25 = vector.load %arg21[%c0_28, %c112] : memref<16x192xf32, #tpu.memory_space<vmem>>, vector<16x16xf32>
    tpu.vector_store %arg21[%c0_28, %c112], %24 {strides = array<i32>} : memref<16x192xf32, #tpu.memory_space<vmem>>, vector<16x16xf32>,
    %c1 = arith.constant 1 : index
    %c0_29 = arith.constant 0 : index
    %26 = vector.load %arg22[%c1, %c0_29] : memref<18x64xf32, #tpu.memory_space<vmem>>, vector<16x16xf32>
    tpu.vector_store %arg22[%c1, %c0_29], %6 {strides = array<i32>} : memref<18x64xf32, #tpu.memory_space<vmem>>, vector<16x16xf32>,
    %27 = vector.extract_strided_slice %6 {offsets = [0, 0], sizes = [1, 16], strides = [1, 1]} : vector<16x16xf32> to vector<1x16xf32>
    %c0_30 = arith.constant 0 : index
    %c0_31 = arith.constant 0 : index
    %28 = vector.load %arg22[%c0_30, %c0_31] : memref<18x64xf32, #tpu.memory_space<vmem>>, vector<1x16xf32>
    tpu.vector_store %arg22[%c0_30, %c0_31], %27 {strides = array<i32>} : memref<18x64xf32, #tpu.memory_space<vmem>>, vector<1x16xf32>,
    %29 = vector.extract_strided_slice %6 {offsets = [15, 0], sizes = [1, 16], strides = [1, 1]} : vector<16x16xf32> to vector<1x16xf32>
    %c17 = arith.constant 17 : index
    %c0_32 = arith.constant 0 : index
    %30 = vector.load %arg22[%c17, %c0_32] : memref<18x64xf32, #tpu.memory_space<vmem>>, vector<1x16xf32>
    tpu.vector_store %arg22[%c17, %c0_32], %29 {strides = array<i32>} : memref<18x64xf32, #tpu.memory_space<vmem>>, vector<1x16xf32>,
    %c0_33 = arith.constant 0 : index
    %c0_34 = arith.constant 0 : index
    %31 = vector.load %arg22[%c0_33, %c0_34] : memref<18x64xf32, #tpu.memory_space<vmem>>, vector<16x16xf32>
    %c1_35 = arith.constant 1 : index
    %c0_36 = arith.constant 0 : index
    %32 = vector.load %arg22[%c1_35, %c0_36] : memref<18x64xf32, #tpu.memory_space<vmem>>, vector<16x16xf32>
    %33 = arith.maximumf %31, %32 : vector<16x16xf32>
    %c2_37 = arith.constant 2 : index
    %c0_38 = arith.constant 0 : index
    %34 = vector.load %arg22[%c2_37, %c0_38] : memref<18x64xf32, #tpu.memory_space<vmem>>, vector<16x16xf32>
    %35 = arith.maximumf %33, %34 : vector<16x16xf32>
    %c0_39 = arith.constant 0 : index
    %c128 = arith.constant 128 : index
    %36 = vector.load %arg21[%c0_39, %c128] : memref<16x192xf32, #tpu.memory_space<vmem>>, vector<16x16xf32>
    tpu.vector_store %arg21[%c0_39, %c128], %35 {strides = array<i32>} : memref<16x192xf32, #tpu.memory_space<vmem>>, vector<16x16xf32>,
    %c0_40 = arith.constant 0 : index
    %c0_41 = arith.constant 0 : index
    %37 = vector.load %arg21[%c0_40, %c0_41] : memref<16x192xf32, #tpu.memory_space<vmem>>, vector<16x144xf32>
    %c0_42 = arith.constant 0 : index
    %c0_43 = arith.constant 0 : index
    %38 = vector.load %arg4[%c0_42, %c0_43] : memref<144x64xf32, #tpu.memory_space<vmem>>, vector<144x64xf32>
    %cst_44 = arith.constant dense<0.000000e+00> : vector<16x64xf32>
    %39 = tpu.matmul %37, %38, %cst_44 {dimension_numbers = #tpu.dot_dimension_numbers<[1], [0], [0], [1], [0, 0, 1, 1], [], []>} : vector<16x144xf32>, vector<144x64xf32>, vector<16x64xf32> -> vector<16x64xf32>
    %c0_45 = arith.constant 0 : index
    %c0_46 = arith.constant 0 : index
    %40 = vector.load %arg5[%c0_45, %c0_46] : memref<1x64xf32, #tpu.memory_space<vmem>>, vector<1x64xf32>
    %41 = vector.broadcast %40 : vector<1x64xf32> to vector<16x64xf32>
    %42 = arith.mulf %39, %41 : vector<16x64xf32>
    %c0_47 = arith.constant 0 : index
    %c0_48 = arith.constant 0 : index
    %43 = vector.load %arg6[%c0_47, %c0_48] : memref<1x64xf32, #tpu.memory_space<vmem>>, vector<1x64xf32>
    %44 = vector.broadcast %43 : vector<1x64xf32> to vector<16x64xf32>
    %45 = arith.addf %42, %44 : vector<16x64xf32>
    %cst_49 = arith.constant 0.000000e+00 : f32
    %46 = vector.broadcast %cst_49 : f32 to vector<16x64xf32>
    %47 = arith.maximumf %45, %46 : vector<16x64xf32>
    %c0_50 = arith.constant 0 : index
    %c0_51 = arith.constant 0 : index
    %48 = vector.load %arg7[%c0_50, %c0_51] : memref<64x16xf32, #tpu.memory_space<vmem>>, vector<64x16xf32>
    %cst_52 = arith.constant dense<0.000000e+00> : vector<16x16xf32>
    %49 = tpu.matmul %47, %48, %cst_52 {dimension_numbers = #tpu.dot_dimension_numbers<[1], [0], [0], [1], [0, 0, 1, 1], [], []>} : vector<16x64xf32>, vector<64x16xf32>, vector<16x16xf32> -> vector<16x16xf32>
    %cst_53 = arith.constant 0.000000e+00 : f32
    %50 = vector.broadcast %cst_53 : f32 to vector<14x16xf32>
    %c0_54 = arith.constant 0 : index
    %c0_55 = arith.constant 0 : index
    %51 = vector.load %arg20[%c0_54, %c0_55] : memref<30x16xf32, #tpu.memory_space<vmem>>, vector<14x16xf32>
    tpu.vector_store %arg20[%c0_54, %c0_55], %50 {strides = array<i32>} : memref<30x16xf32, #tpu.memory_space<vmem>>, vector<14x16xf32>,
    %c14_56 = arith.constant 14 : index
    %c0_57 = arith.constant 0 : index
    %52 = vector.load %arg20[%c14_56, %c0_57] : memref<30x16xf32, #tpu.memory_space<vmem>>, vector<16x16xf32>
    tpu.vector_store %arg20[%c14_56, %c0_57], %49 {strides = array<i32>} : memref<30x16xf32, #tpu.memory_space<vmem>>, vector<16x16xf32>,
    %c14_58 = arith.constant 14 : index
    %c0_59 = arith.constant 0 : index
    %53 = vector.load %arg20[%c14_58, %c0_59] : memref<30x16xf32, #tpu.memory_space<vmem>>, vector<16x16xf32>
    %c0_60 = arith.constant 0 : index
    %c0_61 = arith.constant 0 : index
    %54 = vector.load %arg21[%c0_60, %c0_61] : memref<16x192xf32, #tpu.memory_space<vmem>>, vector<16x16xf32>
    tpu.vector_store %arg21[%c0_60, %c0_61], %53 {strides = array<i32>} : memref<16x192xf32, #tpu.memory_space<vmem>>, vector<16x16xf32>,
    %c12_62 = arith.constant 12 : index
    %c0_63 = arith.constant 0 : index
    %55 = vector.load %arg20[%c12_62, %c0_63] : memref<30x16xf32, #tpu.memory_space<vmem>>, vector<16x16xf32>
    %c0_64 = arith.constant 0 : index
    %c16_65 = arith.constant 16 : index
    %56 = vector.load %arg21[%c0_64, %c16_65] : memref<16x192xf32, #tpu.memory_space<vmem>>, vector<16x16xf32>
    tpu.vector_store %arg21[%c0_64, %c16_65], %55 {strides = array<i32>} : memref<16x192xf32, #tpu.memory_space<vmem>>, vector<16x16xf32>,
    %c10_66 = arith.constant 10 : index
    %c0_67 = arith.constant 0 : index
    %57 = vector.load %arg20[%c10_66, %c0_67] : memref<30x16xf32, #tpu.memory_space<vmem>>, vector<16x16xf32>
    %c0_68 = arith.constant 0 : index
    %c32_69 = arith.constant 32 : index
    %58 = vector.load %arg21[%c0_68, %c32_69] : memref<16x192xf32, #tpu.memory_space<vmem>>, vector<16x16xf32>
    tpu.vector_store %arg21[%c0_68, %c32_69], %57 {strides = array<i32>} : memref<16x192xf32, #tpu.memory_space<vmem>>, vector<16x16xf32>,
    %c8_70 = arith.constant 8 : index
    %c0_71 = arith.constant 0 : index
    %59 = vector.load %arg20[%c8_70, %c0_71] : memref<30x16xf32, #tpu.memory_space<vmem>>, vector<16x16xf32>
    %c0_72 = arith.constant 0 : index
    %c48_73 = arith.constant 48 : index
    %60 = vector.load %arg21[%c0_72, %c48_73] : memref<16x192xf32, #tpu.memory_space<vmem>>, vector<16x16xf32>
    tpu.vector_store %arg21[%c0_72, %c48_73], %59 {strides = array<i32>} : memref<16x192xf32, #tpu.memory_space<vmem>>, vector<16x16xf32>,
    %c6_74 = arith.constant 6 : index
    %c0_75 = arith.constant 0 : index
    %61 = vector.load %arg20[%c6_74, %c0_75] : memref<30x16xf32, #tpu.memory_space<vmem>>, vector<16x16xf32>
    %c0_76 = arith.constant 0 : index
    %c64_77 = arith.constant 64 : index
    %62 = vector.load %arg21[%c0_76, %c64_77] : memref<16x192xf32, #tpu.memory_space<vmem>>, vector<16x16xf32>
    tpu.vector_store %arg21[%c0_76, %c64_77], %61 {strides = array<i32>} : memref<16x192xf32, #tpu.memory_space<vmem>>, vector<16x16xf32>,
    %c4_78 = arith.constant 4 : index
    %c0_79 = arith.constant 0 : index
    %63 = vector.load %arg20[%c4_78, %c0_79] : memref<30x16xf32, #tpu.memory_space<vmem>>, vector<16x16xf32>
    %c0_80 = arith.constant 0 : index
    %c80_81 = arith.constant 80 : index
    %64 = vector.load %arg21[%c0_80, %c80_81] : memref<16x192xf32, #tpu.memory_space<vmem>>, vector<16x16xf32>
    tpu.vector_store %arg21[%c0_80, %c80_81], %63 {strides = array<i32>} : memref<16x192xf32, #tpu.memory_space<vmem>>, vector<16x16xf32>,
    %c2_82 = arith.constant 2 : index
    %c0_83 = arith.constant 0 : index
    %65 = vector.load %arg20[%c2_82, %c0_83] : memref<30x16xf32, #tpu.memory_space<vmem>>, vector<16x16xf32>
    %c0_84 = arith.constant 0 : index
    %c96_85 = arith.constant 96 : index
    %66 = vector.load %arg21[%c0_84, %c96_85] : memref<16x192xf32, #tpu.memory_space<vmem>>, vector<16x16xf32>
    tpu.vector_store %arg21[%c0_84, %c96_85], %65 {strides = array<i32>} : memref<16x192xf32, #tpu.memory_space<vmem>>, vector<16x16xf32>,
    %c0_86 = arith.constant 0 : index
    %c0_87 = arith.constant 0 : index
    %67 = vector.load %arg20[%c0_86, %c0_87] : memref<30x16xf32, #tpu.memory_space<vmem>>, vector<16x16xf32>
    %c0_88 = arith.constant 0 : index
    %c112_89 = arith.constant 112 : index
    %68 = vector.load %arg21[%c0_88, %c112_89] : memref<16x192xf32, #tpu.memory_space<vmem>>, vector<16x16xf32>
    tpu.vector_store %arg21[%c0_88, %c112_89], %67 {strides = array<i32>} : memref<16x192xf32, #tpu.memory_space<vmem>>, vector<16x16xf32>,
    %c1_90 = arith.constant 1 : index
    %c0_91 = arith.constant 0 : index
    %69 = vector.load %arg22[%c1_90, %c0_91] : memref<18x64xf32, #tpu.memory_space<vmem>>, vector<16x64xf32>
    tpu.vector_store %arg22[%c1_90, %c0_91], %47 {strides = array<i32>} : memref<18x64xf32, #tpu.memory_space<vmem>>, vector<16x64xf32>,
    %70 = vector.extract_strided_slice %47 {offsets = [0, 0], sizes = [1, 64], strides = [1, 1]} : vector<16x64xf32> to vector<1x64xf32>
    %c0_92 = arith.constant 0 : index
    %c0_93 = arith.constant 0 : index
    %71 = vector.load %arg22[%c0_92, %c0_93] : memref<18x64xf32, #tpu.memory_space<vmem>>, vector<1x64xf32>
    tpu.vector_store %arg22[%c0_92, %c0_93], %70 {strides = array<i32>} : memref<18x64xf32, #tpu.memory_space<vmem>>, vector<1x64xf32>,
    %72 = vector.extract_strided_slice %47 {offsets = [15, 0], sizes = [1, 64], strides = [1, 1]} : vector<16x64xf32> to vector<1x64xf32>
    %c17_94 = arith.constant 17 : index
    %c0_95 = arith.constant 0 : index
    %73 = vector.load %arg22[%c17_94, %c0_95] : memref<18x64xf32, #tpu.memory_space<vmem>>, vector<1x64xf32>
    tpu.vector_store %arg22[%c17_94, %c0_95], %72 {strides = array<i32>} : memref<18x64xf32, #tpu.memory_space<vmem>>, vector<1x64xf32>,
    %c0_96 = arith.constant 0 : index
    %c0_97 = arith.constant 0 : index
    %74 = vector.load %arg22[%c0_96, %c0_97] : memref<18x64xf32, #tpu.memory_space<vmem>>, vector<16x64xf32>
    %c1_98 = arith.constant 1 : index
    %c0_99 = arith.constant 0 : index
    %75 = vector.load %arg22[%c1_98, %c0_99] : memref<18x64xf32, #tpu.memory_space<vmem>>, vector<16x64xf32>
    %76 = arith.maximumf %74, %75 : vector<16x64xf32>
    %c2_100 = arith.constant 2 : index
    %c0_101 = arith.constant 0 : index
    %77 = vector.load %arg22[%c2_100, %c0_101] : memref<18x64xf32, #tpu.memory_space<vmem>>, vector<16x64xf32>
    %78 = arith.maximumf %76, %77 : vector<16x64xf32>
    %c0_102 = arith.constant 0 : index
    %c128_103 = arith.constant 128 : index
    %79 = vector.load %arg21[%c0_102, %c128_103] : memref<16x192xf32, #tpu.memory_space<vmem>>, vector<16x64xf32>
    tpu.vector_store %arg21[%c0_102, %c128_103], %78 {strides = array<i32>} : memref<16x192xf32, #tpu.memory_space<vmem>>, vector<16x64xf32>,
    %c0_104 = arith.constant 0 : index
    %c0_105 = arith.constant 0 : index
    %80 = vector.load %arg21[%c0_104, %c0_105] : memref<16x192xf32, #tpu.memory_space<vmem>>, vector<16x192xf32>
    %c0_106 = arith.constant 0 : index
    %c0_107 = arith.constant 0 : index
    %81 = vector.load %arg8[%c0_106, %c0_107] : memref<192x64xf32, #tpu.memory_space<vmem>>, vector<192x64xf32>
    %cst_108 = arith.constant dense<0.000000e+00> : vector<16x64xf32>
    %82 = tpu.matmul %80, %81, %cst_108 {dimension_numbers = #tpu.dot_dimension_numbers<[1], [0], [0], [1], [0, 0, 1, 1], [], []>} : vector<16x192xf32>, vector<192x64xf32>, vector<16x64xf32> -> vector<16x64xf32>
    %c0_109 = arith.constant 0 : index
    %c0_110 = arith.constant 0 : index
    %83 = vector.load %arg9[%c0_109, %c0_110] : memref<1x64xf32, #tpu.memory_space<vmem>>, vector<1x64xf32>
    %84 = vector.broadcast %83 : vector<1x64xf32> to vector<16x64xf32>
    %85 = arith.mulf %82, %84 : vector<16x64xf32>
    %c0_111 = arith.constant 0 : index
    %c0_112 = arith.constant 0 : index
    %86 = vector.load %arg10[%c0_111, %c0_112] : memref<1x64xf32, #tpu.memory_space<vmem>>, vector<1x64xf32>
    %87 = vector.broadcast %86 : vector<1x64xf32> to vector<16x64xf32>
    %88 = arith.addf %85, %87 : vector<16x64xf32>
    %cst_113 = arith.constant 0.000000e+00 : f32
    %89 = vector.broadcast %cst_113 : f32 to vector<16x64xf32>
    %90 = arith.maximumf %88, %89 : vector<16x64xf32>
    %c0_114 = arith.constant 0 : index
    %c0_115 = arith.constant 0 : index
    %91 = vector.load %arg11[%c0_114, %c0_115] : memref<64x16xf32, #tpu.memory_space<vmem>>, vector<64x16xf32>
    %cst_116 = arith.constant dense<0.000000e+00> : vector<16x16xf32>
    %92 = tpu.matmul %90, %91, %cst_116 {dimension_numbers = #tpu.dot_dimension_numbers<[1], [0], [0], [1], [0, 0, 1, 1], [], []>} : vector<16x64xf32>, vector<64x16xf32>, vector<16x16xf32> -> vector<16x16xf32>
    %cst_117 = arith.constant 0.000000e+00 : f32
    %93 = vector.broadcast %cst_117 : f32 to vector<14x16xf32>
    %c0_118 = arith.constant 0 : index
    %c0_119 = arith.constant 0 : index
    %94 = vector.load %arg20[%c0_118, %c0_119] : memref<30x16xf32, #tpu.memory_space<vmem>>, vector<14x16xf32>
    tpu.vector_store %arg20[%c0_118, %c0_119], %93 {strides = array<i32>} : memref<30x16xf32, #tpu.memory_space<vmem>>, vector<14x16xf32>,
    %c14_120 = arith.constant 14 : index
    %c0_121 = arith.constant 0 : index
    %95 = vector.load %arg20[%c14_120, %c0_121] : memref<30x16xf32, #tpu.memory_space<vmem>>, vector<16x16xf32>
    tpu.vector_store %arg20[%c14_120, %c0_121], %92 {strides = array<i32>} : memref<30x16xf32, #tpu.memory_space<vmem>>, vector<16x16xf32>,
    %c14_122 = arith.constant 14 : index
    %c0_123 = arith.constant 0 : index
    %96 = vector.load %arg20[%c14_122, %c0_123] : memref<30x16xf32, #tpu.memory_space<vmem>>, vector<16x16xf32>
    %c0_124 = arith.constant 0 : index
    %c0_125 = arith.constant 0 : index
    %97 = vector.load %arg21[%c0_124, %c0_125] : memref<16x192xf32, #tpu.memory_space<vmem>>, vector<16x16xf32>
    tpu.vector_store %arg21[%c0_124, %c0_125], %96 {strides = array<i32>} : memref<16x192xf32, #tpu.memory_space<vmem>>, vector<16x16xf32>,
    %c12_126 = arith.constant 12 : index
    %c0_127 = arith.constant 0 : index
    %98 = vector.load %arg20[%c12_126, %c0_127] : memref<30x16xf32, #tpu.memory_space<vmem>>, vector<16x16xf32>
    %c0_128 = arith.constant 0 : index
    %c16_129 = arith.constant 16 : index
    %99 = vector.load %arg21[%c0_128, %c16_129] : memref<16x192xf32, #tpu.memory_space<vmem>>, vector<16x16xf32>
    tpu.vector_store %arg21[%c0_128, %c16_129], %98 {strides = array<i32>} : memref<16x192xf32, #tpu.memory_space<vmem>>, vector<16x16xf32>,
    %c10_130 = arith.constant 10 : index
    %c0_131 = arith.constant 0 : index
    %100 = vector.load %arg20[%c10_130, %c0_131] : memref<30x16xf32, #tpu.memory_space<vmem>>, vector<16x16xf32>
    %c0_132 = arith.constant 0 : index
    %c32_133 = arith.constant 32 : index
    %101 = vector.load %arg21[%c0_132, %c32_133] : memref<16x192xf32, #tpu.memory_space<vmem>>, vector<16x16xf32>
    tpu.vector_store %arg21[%c0_132, %c32_133], %100 {strides = array<i32>} : memref<16x192xf32, #tpu.memory_space<vmem>>, vector<16x16xf32>,
    %c8_134 = arith.constant 8 : index
    %c0_135 = arith.constant 0 : index
    %102 = vector.load %arg20[%c8_134, %c0_135] : memref<30x16xf32, #tpu.memory_space<vmem>>, vector<16x16xf32>
    %c0_136 = arith.constant 0 : index
    %c48_137 = arith.constant 48 : index
    %103 = vector.load %arg21[%c0_136, %c48_137] : memref<16x192xf32, #tpu.memory_space<vmem>>, vector<16x16xf32>
    tpu.vector_store %arg21[%c0_136, %c48_137], %102 {strides = array<i32>} : memref<16x192xf32, #tpu.memory_space<vmem>>, vector<16x16xf32>,
    %c6_138 = arith.constant 6 : index
    %c0_139 = arith.constant 0 : index
    %104 = vector.load %arg20[%c6_138, %c0_139] : memref<30x16xf32, #tpu.memory_space<vmem>>, vector<16x16xf32>
    %c0_140 = arith.constant 0 : index
    %c64_141 = arith.constant 64 : index
    %105 = vector.load %arg21[%c0_140, %c64_141] : memref<16x192xf32, #tpu.memory_space<vmem>>, vector<16x16xf32>
    tpu.vector_store %arg21[%c0_140, %c64_141], %104 {strides = array<i32>} : memref<16x192xf32, #tpu.memory_space<vmem>>, vector<16x16xf32>,
    %c4_142 = arith.constant 4 : index
    %c0_143 = arith.constant 0 : index
    %106 = vector.load %arg20[%c4_142, %c0_143] : memref<30x16xf32, #tpu.memory_space<vmem>>, vector<16x16xf32>
    %c0_144 = arith.constant 0 : index
    %c80_145 = arith.constant 80 : index
    %107 = vector.load %arg21[%c0_144, %c80_145] : memref<16x192xf32, #tpu.memory_space<vmem>>, vector<16x16xf32>
    tpu.vector_store %arg21[%c0_144, %c80_145], %106 {strides = array<i32>} : memref<16x192xf32, #tpu.memory_space<vmem>>, vector<16x16xf32>,
    %c2_146 = arith.constant 2 : index
    %c0_147 = arith.constant 0 : index
    %108 = vector.load %arg20[%c2_146, %c0_147] : memref<30x16xf32, #tpu.memory_space<vmem>>, vector<16x16xf32>
    %c0_148 = arith.constant 0 : index
    %c96_149 = arith.constant 96 : index
    %109 = vector.load %arg21[%c0_148, %c96_149] : memref<16x192xf32, #tpu.memory_space<vmem>>, vector<16x16xf32>
    tpu.vector_store %arg21[%c0_148, %c96_149], %108 {strides = array<i32>} : memref<16x192xf32, #tpu.memory_space<vmem>>, vector<16x16xf32>,
    %c0_150 = arith.constant 0 : index
    %c0_151 = arith.constant 0 : index
    %110 = vector.load %arg20[%c0_150, %c0_151] : memref<30x16xf32, #tpu.memory_space<vmem>>, vector<16x16xf32>
    %c0_152 = arith.constant 0 : index
    %c112_153 = arith.constant 112 : index
    %111 = vector.load %arg21[%c0_152, %c112_153] : memref<16x192xf32, #tpu.memory_space<vmem>>, vector<16x16xf32>
    tpu.vector_store %arg21[%c0_152, %c112_153], %110 {strides = array<i32>} : memref<16x192xf32, #tpu.memory_space<vmem>>, vector<16x16xf32>,
    %c1_154 = arith.constant 1 : index
    %c0_155 = arith.constant 0 : index
    %112 = vector.load %arg22[%c1_154, %c0_155] : memref<18x64xf32, #tpu.memory_space<vmem>>, vector<16x64xf32>
    tpu.vector_store %arg22[%c1_154, %c0_155], %90 {strides = array<i32>} : memref<18x64xf32, #tpu.memory_space<vmem>>, vector<16x64xf32>,
    %113 = vector.extract_strided_slice %90 {offsets = [0, 0], sizes = [1, 64], strides = [1, 1]} : vector<16x64xf32> to vector<1x64xf32>
    %c0_156 = arith.constant 0 : index
    %c0_157 = arith.constant 0 : index
    %114 = vector.load %arg22[%c0_156, %c0_157] : memref<18x64xf32, #tpu.memory_space<vmem>>, vector<1x64xf32>
    tpu.vector_store %arg22[%c0_156, %c0_157], %113 {strides = array<i32>} : memref<18x64xf32, #tpu.memory_space<vmem>>, vector<1x64xf32>,
    %115 = vector.extract_strided_slice %90 {offsets = [15, 0], sizes = [1, 64], strides = [1, 1]} : vector<16x64xf32> to vector<1x64xf32>
    %c17_158 = arith.constant 17 : index
    %c0_159 = arith.constant 0 : index
    %116 = vector.load %arg22[%c17_158, %c0_159] : memref<18x64xf32, #tpu.memory_space<vmem>>, vector<1x64xf32>
    tpu.vector_store %arg22[%c17_158, %c0_159], %115 {strides = array<i32>} : memref<18x64xf32, #tpu.memory_space<vmem>>, vector<1x64xf32>,
    %c0_160 = arith.constant 0 : index
    %c0_161 = arith.constant 0 : index
    %117 = vector.load %arg22[%c0_160, %c0_161] : memref<18x64xf32, #tpu.memory_space<vmem>>, vector<16x64xf32>
    %c1_162 = arith.constant 1 : index
    %c0_163 = arith.constant 0 : index
    %118 = vector.load %arg22[%c1_162, %c0_163] : memref<18x64xf32, #tpu.memory_space<vmem>>, vector<16x64xf32>
    %119 = arith.maximumf %117, %118 : vector<16x64xf32>
    %c2_164 = arith.constant 2 : index
    %c0_165 = arith.constant 0 : index
    %120 = vector.load %arg22[%c2_164, %c0_165] : memref<18x64xf32, #tpu.memory_space<vmem>>, vector<16x64xf32>
    %121 = arith.maximumf %119, %120 : vector<16x64xf32>
    %c0_166 = arith.constant 0 : index
    %c128_167 = arith.constant 128 : index
    %122 = vector.load %arg21[%c0_166, %c128_167] : memref<16x192xf32, #tpu.memory_space<vmem>>, vector<16x64xf32>
    tpu.vector_store %arg21[%c0_166, %c128_167], %121 {strides = array<i32>} : memref<16x192xf32, #tpu.memory_space<vmem>>, vector<16x64xf32>,
    %c0_168 = arith.constant 0 : index
    %c0_169 = arith.constant 0 : index
    %123 = vector.load %arg21[%c0_168, %c0_169] : memref<16x192xf32, #tpu.memory_space<vmem>>, vector<16x192xf32>
    %c0_170 = arith.constant 0 : index
    %c0_171 = arith.constant 0 : index
    %124 = vector.load %arg12[%c0_170, %c0_171] : memref<192x64xf32, #tpu.memory_space<vmem>>, vector<192x64xf32>
    %cst_172 = arith.constant dense<0.000000e+00> : vector<16x64xf32>
    %125 = tpu.matmul %123, %124, %cst_172 {dimension_numbers = #tpu.dot_dimension_numbers<[1], [0], [0], [1], [0, 0, 1, 1], [], []>} : vector<16x192xf32>, vector<192x64xf32>, vector<16x64xf32> -> vector<16x64xf32>
    %c0_173 = arith.constant 0 : index
    %c0_174 = arith.constant 0 : index
    %126 = vector.load %arg13[%c0_173, %c0_174] : memref<1x64xf32, #tpu.memory_space<vmem>>, vector<1x64xf32>
    %127 = vector.broadcast %126 : vector<1x64xf32> to vector<16x64xf32>
    %128 = arith.mulf %125, %127 : vector<16x64xf32>
    %c0_175 = arith.constant 0 : index
    %c0_176 = arith.constant 0 : index
    %129 = vector.load %arg14[%c0_175, %c0_176] : memref<1x64xf32, #tpu.memory_space<vmem>>, vector<1x64xf32>
    %130 = vector.broadcast %129 : vector<1x64xf32> to vector<16x64xf32>
    %131 = arith.addf %128, %130 : vector<16x64xf32>
    %c0_177 = arith.constant 0 : index
    %c0_178 = arith.constant 0 : index
    %132 = vector.load %arg15[%c0_177, %c0_178] : memref<16x64xf32, #tpu.memory_space<vmem>>, vector<16x64xf32>
    %cst_179 = arith.constant dense<0.000000e+00> : vector<16x64xf32>
    %133 = tpu.matmul %6, %132, %cst_179 {dimension_numbers = #tpu.dot_dimension_numbers<[1], [0], [0], [1], [0, 0, 1, 1], [], []>} : vector<16x16xf32>, vector<16x64xf32>, vector<16x64xf32> -> vector<16x64xf32>
    %c0_180 = arith.constant 0 : index
    %c0_181 = arith.constant 0 : index
    %134 = vector.load %arg16[%c0_180, %c0_181] : memref<1x64xf32, #tpu.memory_space<vmem>>, vector<1x64xf32>
    %135 = vector.broadcast %134 : vector<1x64xf32> to vector<16x64xf32>
    %136 = arith.mulf %133, %135 : vector<16x64xf32>
    %c0_182 = arith.constant 0 : index
    %c0_183 = arith.constant 0 : index
    %137 = vector.load %arg17[%c0_182, %c0_183] : memref<1x64xf32, #tpu.memory_space<vmem>>, vector<1x64xf32>
    %138 = vector.broadcast %137 : vector<1x64xf32> to vector<16x64xf32>
    %139 = arith.addf %136, %138 : vector<16x64xf32>
    %140 = arith.addf %131, %139 : vector<16x64xf32>
    %cst_184 = arith.constant 0.000000e+00 : f32
    %141 = vector.broadcast %cst_184 : f32 to vector<16x64xf32>
    %142 = arith.maximumf %140, %141 : vector<16x64xf32>
    %c0_185 = arith.constant 0 : index
    %c0_186 = arith.constant 0 : index
    %143 = vector.load %arg18[%c0_185, %c0_186] : memref<64x16xf32, #tpu.memory_space<vmem>>, vector<64x16xf32>
    %cst_187 = arith.constant dense<0.000000e+00> : vector<16x16xf32>
    %144 = tpu.matmul %142, %143, %cst_187 {dimension_numbers = #tpu.dot_dimension_numbers<[1], [0], [0], [1], [0, 0, 1, 1], [], []>} : vector<16x64xf32>, vector<64x16xf32>, vector<16x16xf32> -> vector<16x16xf32>
    %c0_188 = arith.constant 0 : index
    %c0_189 = arith.constant 0 : index
    %c0_190 = arith.constant 0 : index
    %145 = vector.load %arg19[%c0_188, %c0_189, %c0_190] : memref<1x16x16xf32, #tpu.memory_space<vmem>>, vector<1x16x16xf32>
    %146 = vector.shape_cast %145 : vector<1x16x16xf32> to vector<16x16xf32>
    %147 = vector.shape_cast %144 : vector<16x16xf32> to vector<1x16x16xf32>
    tpu.vector_store %arg19[%c0_188, %c0_189, %c0_190], %147 {strides = array<i32>} : memref<1x16x16xf32, #tpu.memory_space<vmem>>, vector<1x16x16xf32>,
    return
  }
  func.func @transform_0(%arg0: i32) -> (i32, i32, i32) {
    %c0_i32 = arith.constant 0 : i32
    %c0_i32_0 = arith.constant 0 : i32
    %c0_i32_1 = arith.constant 0 : i32
    return %arg0, %c0_i32, %c0_i32_0 : i32, i32, i32
  }
  func.func @transform_1(%arg0: i32) -> (i32, i32) {
    %c0_i32 = arith.constant 0 : i32
    %c0_i32_0 = arith.constant 0 : i32
    %c0_i32_1 = arith.constant 0 : i32
    return %c0_i32, %c0_i32_0 : i32, i32
  }
  func.func @transform_2(%arg0: i32) -> (i32, i32) {
    %c0_i32 = arith.constant 0 : i32
    %c0_i32_0 = arith.constant 0 : i32
    %c0_i32_1 = arith.constant 0 : i32
    return %c0_i32, %c0_i32_0 : i32, i32
  }
  func.func @transform_3(%arg0: i32) -> (i32, i32) {
    %c0_i32 = arith.constant 0 : i32
    %c0_i32_0 = arith.constant 0 : i32
    %c0_i32_1 = arith.constant 0 : i32
    return %c0_i32, %c0_i32_0 : i32, i32
  }
  func.func @transform_4(%arg0: i32) -> (i32, i32) {
    %c0_i32 = arith.constant 0 : i32
    %c0_i32_0 = arith.constant 0 : i32
    %c0_i32_1 = arith.constant 0 : i32
    return %c0_i32, %c0_i32_0 : i32, i32
  }
  func.func @transform_5(%arg0: i32) -> (i32, i32) {
    %c0_i32 = arith.constant 0 : i32
    %c0_i32_0 = arith.constant 0 : i32
    %c0_i32_1 = arith.constant 0 : i32
    return %c0_i32, %c0_i32_0 : i32, i32
  }
  func.func @transform_6(%arg0: i32) -> (i32, i32) {
    %c0_i32 = arith.constant 0 : i32
    %c0_i32_0 = arith.constant 0 : i32
    %c0_i32_1 = arith.constant 0 : i32
    return %c0_i32, %c0_i32_0 : i32, i32
  }
  func.func @transform_7(%arg0: i32) -> (i32, i32) {
    %c0_i32 = arith.constant 0 : i32
    %c0_i32_0 = arith.constant 0 : i32
    %c0_i32_1 = arith.constant 0 : i32
    return %c0_i32, %c0_i32_0 : i32, i32
  }
  func.func @transform_8(%arg0: i32) -> (i32, i32) {
    %c0_i32 = arith.constant 0 : i32
    %c0_i32_0 = arith.constant 0 : i32
    %c0_i32_1 = arith.constant 0 : i32
    return %c0_i32, %c0_i32_0 : i32, i32
  }
  func.func @transform_9(%arg0: i32) -> (i32, i32) {
    %c0_i32 = arith.constant 0 : i32
    %c0_i32_0 = arith.constant 0 : i32
    %c0_i32_1 = arith.constant 0 : i32
    return %c0_i32, %c0_i32_0 : i32, i32
  }
  func.func @transform_10(%arg0: i32) -> (i32, i32) {
    %c0_i32 = arith.constant 0 : i32
    %c0_i32_0 = arith.constant 0 : i32
    %c0_i32_1 = arith.constant 0 : i32
    return %c0_i32, %c0_i32_0 : i32, i32
  }
  func.func @transform_11(%arg0: i32) -> (i32, i32) {
    %c0_i32 = arith.constant 0 : i32
    %c0_i32_0 = arith.constant 0 : i32
    %c0_i32_1 = arith.constant 0 : i32
    return %c0_i32, %c0_i32_0 : i32, i32
  }
  func.func @transform_12(%arg0: i32) -> (i32, i32) {
    %c0_i32 = arith.constant 0 : i32
    %c0_i32_0 = arith.constant 0 : i32
    %c0_i32_1 = arith.constant 0 : i32
    return %c0_i32, %c0_i32_0 : i32, i32
  }
  func.func @transform_13(%arg0: i32) -> (i32, i32) {
    %c0_i32 = arith.constant 0 : i32
    %c0_i32_0 = arith.constant 0 : i32
    %c0_i32_1 = arith.constant 0 : i32
    return %c0_i32, %c0_i32_0 : i32, i32
  }
  func.func @transform_14(%arg0: i32) -> (i32, i32) {
    %c0_i32 = arith.constant 0 : i32
    %c0_i32_0 = arith.constant 0 : i32
    %c0_i32_1 = arith.constant 0 : i32
    return %c0_i32, %c0_i32_0 : i32, i32
  }
  func.func @transform_15(%arg0: i32) -> (i32, i32) {
    %c0_i32 = arith.constant 0 : i32
    %c0_i32_0 = arith.constant 0 : i32
    %c0_i32_1 = arith.constant 0 : i32
    return %c0_i32, %c0_i32_0 : i32, i32
  }
  func.func @transform_16(%arg0: i32) -> (i32, i32) {
    %c0_i32 = arith.constant 0 : i32
    %c0_i32_0 = arith.constant 0 : i32
    %c0_i32_1 = arith.constant 0 : i32
    return %c0_i32, %c0_i32_0 : i32, i32
  }
  func.func @transform_17(%arg0: i32) -> (i32, i32) {
    %c0_i32 = arith.constant 0 : i32
    %c0_i32_0 = arith.constant 0 : i32
    %c0_i32_1 = arith.constant 0 : i32
    return %c0_i32, %c0_i32_0 : i32, i32
  }
  func.func @transform_18(%arg0: i32) -> (i32, i32, i32) {
    %c0_i32 = arith.constant 0 : i32
    %c0_i32_0 = arith.constant 0 : i32
    %c0_i32_1 = arith.constant 0 : i32
    return %arg0, %c0_i32, %c0_i32_0 : i32, i32, i32
  }
}

</mosaic_0001>

<bundles_post_ra>
// kernel: tpu_custom_call.1
= control target key start
LH: loop header
LB: loop body
LE: loop exit
PB: predicated region body
PF: predicated region fallthrough
CT: control target
= control target key end

     0   :  { %s2952_s0 = inlined_call_operand.vmem [shape: f32[2,16,4], index: 0, kind: input, shape index: {}]   ;;  %s2953_s1 = inlined_call_operand.vmem [shape: f32[4,16], index: 1, kind: input, shape index: {}]   ;;  %s2954_s2 = inlined_call_operand.vmem [shape: f32[1,16], index: 2, kind: input, shape index: {}]   ;;  %s2955_s3 = inlined_call_operand.vmem [shape: f32[144,64], index: 3, kind: input, shape index: {}]   ;;  %s2956_s4 = inlined_call_operand.vmem [shape: f32[1,64], index: 4, kind: input, shape index: {}]   ;;  %s2957_s5 = inlined_call_operand.vmem [shape: f32[1,64], index: 5, kind: input, shape index: {}]   ;;  %s2958_s6 = inlined_call_operand.vmem [shape: f32[64,16], index: 6, kind: input, shape index: {}]   ;;  %s2959_s7 = inlined_call_operand.vmem [shape: f32[192,64], index: 7, kind: input, shape index: {}]   ;;  %s2960_s8 = inlined_call_operand.vmem [shape: f32[1,64], index: 8, kind: input, shape index: {}]   ;;  %s2961_s9 = inlined_call_operand.vmem [shape: f32[1,64], index: 9, kind: input, shape index: {}]   ;;  %s2962_s10 = inlined_call_operand.vmem [shape: f32[64,16], index: 10, kind: input, shape index: {}]   ;;  %s2963_s11 = inlined_call_operand.vmem [shape: f32[192,64], index: 11, kind: input, shape index: {}]   ;;  %s2964_s12 = inlined_call_operand.vmem [shape: f32[1,64], index: 12, kind: input, shape index: {}]   ;;  %s2965_s13 = inlined_call_operand.vmem [shape: f32[1,64], index: 13, kind: input, shape index: {}]   ;;  %s2966_s14 = inlined_call_operand.vmem [shape: f32[16,64], index: 14, kind: input, shape index: {}]   ;;  %s2967_s15 = inlined_call_operand.vmem [shape: f32[1,64], index: 15, kind: input, shape index: {}]   ;;  %s2968_s16 = inlined_call_operand.vmem [shape: f32[1,64], index: 16, kind: input, shape index: {}]   ;;  %s2969_s17 = inlined_call_operand.vmem [shape: f32[64,16], index: 17, kind: input, shape index: {}]   ;;  %s2970_s18 = inlined_call_operand.hbm [shape: f32[2,16,16], index: 18, kind: output, shape index: {}]  }
   0x1   :  { %2991 = sst [smem:[#allocation14_spill]] %s2952_s0 }
   0x2   :  { %2992 = sst [smem:[#allocation15_spill]] %s2953_s1 }
   0x3   :  { %2993 = sst [smem:[#allocation16_spill]] %s2954_s2 }
   0x4   :  { %2994 = sst [smem:[#allocation17_spill]] %s2955_s3 }
   0x5   :  { %2995 = sst [smem:[#allocation18_spill]] %s2956_s4 }
   0x6   :  { %2996 = sst [smem:[#allocation19_spill]] %s2957_s5 }
   0x7   :  { %2997 = sst [smem:[#allocation20_spill]] %s2958_s6 }
   0x8   :  { %2998 = sst [smem:[#allocation21_spill]] %s2959_s7 }
   0x9   :  { %23 = vsyncpa [#allocation6], 0 }
   0xa   :  { %25 = vsyncpa [#allocation6 + $0x1], 0  ;;  %s2355_s27 = smov 0   ;;  %s2357_s28 = smov 0  }
   0xb   :  { %s2359_s29 = smov 0   ;;  %s2361_s30 = smov 0  }
   0xc LB: > { %2999 = sst [smem:[#allocation8_spill]] %s2234_s27  ;;  %s2376_s0 = sadd.s32 4294967295, %s2246_s30   ;;  %s2246_s30 = sphi %s2361_s30, %s3025_s30   ;;  %s2242_s29 = sphi %s2359_s29, %s3027_s29   ;;  %s2238_s28 = sphi %s2357_s28, %s3029_s28   ;;  %s2234_s27 = sphi %s2355_s27, %s3028_s27  }
   0xd   : > { %3000 = sst [smem:[#allocation9_spill]] %s2242_s29  ;;  %s1837_s19 = sadd.s32 4294967294, %s2246_s30  }
   0xe   : > { %3001 = sst [smem:[#allocation10_spill]] %s2246_s30  ;;  %s2380_s1 = sadd.s32 1, %s2246_s30  }
   0xf   : > { %3002 = sst [smem:[#allocation11_spill]] %s2380_s1  ;;  %s421_s20 = sadd.s32 1, %s2242_s29 }
  0x10   : > { %s418_s21 = ssub.s32 %s2246_s30, %s2380_s1  ;;  %p431_p0 = scmp.ne.s32.totalorder %s2242_s29, %s2238_s28 }
  0x11   : > { %p419_p1 = scmp.eq.s32.totalorder %s418_s21, 0  ;;  %p432_p2 = scmp.eq.s32.totalorder %s2376_s0, 1 }
  0x12   : > { %p437_p3 = scmp.ne.s32.totalorder %s2238_s28, %s2234_s27  ;;  %p438_p4 = scmp.eq.s32.totalorder %s1837_s19, 1 }
  0x13   : > { %s2391_s22 = scalar_select %p419_p1, %s2242_s29, %s421_s20  }
  0x14   : > { %p2393_p5 = por %p432_p2, %p431_p0  ;;  %p2397_p6 = por %p438_p4, %p437_p3 }
  0x15   : > { %3003 = sst [smem:[#allocation12_spill]] %s2391_s22  ;;  %p1840_p7 = scmp.ge.s32.totalorder %s2246_s30, 1 }
  0x16   : > { %s3005_s23 = scalar_select %p2397_p6, 1, 0 }
  0x17   : > { %p515_p8 = scmp.lt.s32.totalorder %s2246_s30, 3 }
  0x18   : > { %3006 = sst [smem:[#allocation13_spill]] %s3005_s23 }
  0x19   : > { %p516_p9 = pnand %p1840_p7, %p515_p8 }
  0x1a   : > { %s3007_s26 = sld [smem:[#allocation15_spill]] (!%p516_p9)  ;;  %vm591_vm0 = vcmask (!%p516_p9), 1043456   ;;  %p569_p10 = scmp.lt.s32.totalorder (!%p516_p9), %s2376_s0, 1  ;;  %vm670_vm1 = vcmask (!%p516_p9), 130048   ;;  %vm672_vm2 = vcmask (!%p516_p9), 128000   ;;  %v2248_v1 = vmov (!%p516_p9), 0.0  }
  0x1b   : > { %519 = sbr.rel (%p516_p9) target bundleno = 2044 (0x7fc), region = 92  ;;  %671 = vst.msk [vmem:[#allocation2] sm:$0xff] (!%p516_p9), %vm670_vm1, %v2248_v1  ;;  %vm584_vm3 = vcmask (!%p516_p9), 31744   ;;  %s3008_s25 = sld [smem:[#allocation14_spill]] (!%p516_p9)  ;;  %v2253_v11 = vmov (!%p516_p9), 0.0|0.0   ;;  %vm775_vm4 = vcmask (!%p516_p9), 130055  }
  0x1c   : > { %673 = vst.msk [vmem:[#allocation2 + $0x8] sm:$0x3f] (!%p516_p9), %vm672_vm2, %v2248_v1  ;;  %s2974_s22 = smov (!%p516_p9), 64   ;;  %s2986_s29 = smov (!%p516_p9), 80   ;;  %vm773_vm5 = vcmask (!%p516_p9), 122880   ;;  %vm690_vm6 = vcmask (!%p516_p9), 261248  }
  0x1d   : > { %s2976_s1 = smov (!%p516_p9), 96   ;;  %s3009_s3 = sld [smem:[#allocation17_spill]] (!%p516_p9)  ;;  %vm703_vm7 = vcmask (!%p516_p9), 392448   ;;  %vm716_vm8 = vcmask (!%p516_p9), 523648   ;;  %vm729_vm9 = vcmask (!%p516_p9), 654848   ;;  %vm742_vm10 = vcmask (!%p516_p9), 786048  }
  0x1e   : > { %s2984_s21 = smov (!%p516_p9), 32   ;;  %s3011_s24 = smov (!%p516_p9), 112   ;;  %vm755_vm11 = vcmask (!%p516_p9), 917248   ;;  %vm768_vm12 = vcmask (!%p516_p9), 1048448   ;;  %vm920_vm13 = vcmask (!%p516_p9), 523264   ;;  %vm1096_vm14 = vcmask (!%p516_p9), 516096  }
  0x1f   : > { %s3014_s6 = sld [smem:[#allocation20_spill]] (!%p516_p9)  ;;  %s3015_s4 = sld [smem:[#allocation18_spill]] (!%p516_p9)  ;;  %vm1098_vm15 = vcmask (!%p516_p9), 523271  }
  0x20   : > { %v576_v0 = vld [vmem:[%s3007_s26] sm:$0xf] (!%p516_p9)  ;;  %s3016_s5 = sld [smem:[#allocation19_spill]] (!%p516_p9)  ;;  %s3018_s7 = sld [smem:[#allocation21_spill]] (!%p516_p9) }
  0x21   : > { %1914 = vmatprep.subr.msk.mxu1 (!%p516_p9), %vm591_vm0, %v576_v0  ;;  %s1876_s27 = sshll.u32 (!%p516_p9), %s2376_s0, 8 }
  0x22   : > { %1915 = vmatpush3.msk.msra.mxu1 %vm591_vm0, %v576_v0  ;;  %s570_s19 = scalar_select %p569_p10, %s2376_s0, 1  ;;  %v758_v7 = vld [vmem:[#allocation2] sm:$0xff] }
  0x23   : > { %v719_v4 = vld [vmem:[#allocation2 + $0x6] sm:$0xff]  ;;  %v795_v10 = vld [vmem:[%s3009_s3 + $0x10] sm:$0xff]  ;;  %1983 = vmatprep.subr.bf16.mxu1 %v2253_v11  ;;  %v796_v13 = vld [vmem:[%s3009_s3 + $0x18] sm:$0xff]  ;;  %s2257_s0 = smov [#allocation5]  }
  0x24   : > { %s1875_s20 = sshll.u32 %s570_s19, 4  ;;  %723 = vrot.lane.b32.xlu1 %v719_v4, %s2974_s22  ;;  %v732_v5 = vld [vmem:[#allocation2 + $0x4] sm:$0xff]  ;;  %s2978_s19 = smov 112   ;;  %v1987_v14 = vpack.c.bf16 %v796_v13, %v795_v10  ;;  %v799_v18 = vld [vmem:[%s3009_s3 + $0x30] sm:$0xff]  ;;  %v800_v19 = vld [vmem:[%s3009_s3 + $0x38] sm:$0xff] }
  0x25   : > { %s573_s26 = scalar_lea.vmem %s3008_s25, %s1875_s20  ;;  %v745_v6 = vld [vmem:[#allocation2 + $0x2] sm:$0xff]  ;;  %v1993_v20 = vpack.c.bf16 %v800_v19, %v799_v18  ;;  %v803_v26 = vld [vmem:[%s3009_s3 + $0x50] sm:$0xff]  ;;  %v804_v27 = vld [vmem:[%s3009_s3 + $0x58] sm:$0xff]  ;;  %s2980_s25 = smov 48  }
  0x26   : > { %v574_v2 = vld [vmem:[%s573_s26] sm:$0xff]  ;;  %v575_v3 = vld [vmem:[%s573_s26 + $0x8] sm:$0xff]  ;;  %1002 = vst.msk [vmem:[#allocation2] sm:$0xff] %vm670_vm1, %v2248_v1  ;;  %v1999_v30 = vpack.c.bf16 %v804_v27, %v803_v26  ;;  %v807_v35 = vld [vmem:[%s3009_s3 + $0x70] sm:$0xff]  ;;  %s2982_s22 = smov 16   ;;  %s3012_s26 = smov 64  }
  0x27   : > { %1916 = vmatprep.mubr.msk.f32.mxu1 %vm584_vm3, %v574_v2  ;;  %v793_v8 = vld [vmem:[%s3009_s3] sm:$0xff]  ;;  %v794_v9 = vld [vmem:[%s3009_s3 + $0x8] sm:$0xff]  ;;  %v808_v36 = vld [vmem:[%s3009_s3 + $0x78] sm:$0xff]  ;;  %s2907_s20 = scalar_lea.hbm %s2970_s18, %s1876_s27 }
  0x28   : > { %1917 = vmatmul.mubr.msk.f32.vlgmr.msra.gmra.mrb[0].mxu1 %vm584_vm3, %v575_v3  ;;  %736 = vrot.lane.b32.xlu1 %v732_v5, %s2986_s29  ;;  %v1984_v12 = vpack.c.bf16 %v794_v9, %v793_v8  ;;  %v797_v15 = vld [vmem:[%s3009_s3 + $0x20] sm:$0xff]  ;;  %v798_v16 = vld [vmem:[%s3009_s3 + $0x28] sm:$0xff]  ;;  %v2005_v38 = vpack.c.bf16 %v808_v36, %v807_v35  ;;  %v914_v18 = vld [vmem:[%s3014_s6 + $0x10] sm:$0xff] }
  0x29   : > { %v1990_v17 = vpack.c.bf16 %v798_v16, %v797_v15  ;;  %v801_v21 = vld [vmem:[%s3009_s3 + $0x40] sm:$0xff]  ;;  %v802_v22 = vld [vmem:[%s3009_s3 + $0x48] sm:$0xff]  ;;  %v915_v19 = vld [vmem:[%s3014_s6 + $0x18] sm:$0xff] }
  0x2a   : > { %1985 = vmatpush1.bf16.msra.mxu1 %v1984_v12  ;;  %v1996_v23 = vpack.c.bf16 %v802_v22, %v801_v21  ;;  %v805_v32 = vld [vmem:[%s3009_s3 + $0x60] sm:$0xff]  ;;  %v806_v33 = vld [vmem:[%s3009_s3 + $0x68] sm:$0xff] }
  0x2b   : > { %1986 = vmatprep.subr.bf16.mxu1 %v2253_v11  ;;  %v2002_v34 = vpack.c.bf16 %v806_v33, %v805_v32  ;;  %v809_v50 = vld [vmem:[%s3009_s3 + $0x80] sm:$0xff]  ;;  %v810_v53 = vld [vmem:[%s3009_s3 + $0x88] sm:$0xff]  ;;  %s566_s3 = sand.u32 1, %s2238_s28  }
  0x2c   : > { %749 = vrot.lane.b32.xlu1 %v745_v6, %s2976_s1  ;;  %s3010_s1 = sld [smem:[#allocation16_spill]]  ;;  %v2008_v55 = vpack.c.bf16 %v810_v53, %v809_v50  ;;  %v912_v15 = vld [vmem:[%s3014_s6] sm:$0xff]  ;;  %v913_v16 = vld [vmem:[%s3014_s6 + $0x8] sm:$0xff]  ;;  %s1841_s23 = sshll.u32 %s566_s3, 4 }
  0x2d   : > { %v916_v21 = vld [vmem:[%s3014_s6 + $0x20] sm:$0xff]  ;;  %v917_v22 = vld [vmem:[%s3014_s6 + $0x28] sm:$0xff] }
  0x2e   : > { %1988 = vmatpush1.bf16.msra.mxu1 %v1987_v14  ;;  %v1851_v32 = vld [vmem:[%s3016_s5] ss:$0 sm:$0xff] }
  0x2f   : > { %1989 = vmatprep.subr.bf16.mxu1 %v2253_v11 }
  0x30   : > { %762 = vrot.lane.b32.xlu1 %v758_v7, %s2978_s19 }
  0x32   : > { %1991 = vmatpush1.bf16.msra.mxu1 %v1990_v17  ;;  %v1844_v24 = vld [vmem:[%s3010_s1] ss:$0 sm:$0xff]  ;;  %s3013_s1 = smov 96   ;;  %v2010_v17 = vpack.c.bf16 %v913_v16, %v912_v15  ;;  %v1130_v15 = vld [vmem:[%s3018_s7 + $0x70] sm:$0xff]  ;;  %v1131_v16 = vld [vmem:[%s3018_s7 + $0x78] sm:$0xff] }
  0x33   : > { %1992 = vmatprep.subr.bf16.mxu1 %v2253_v11 }
  0x34   : > { %2011 = vmatprep.subr.bf16.mxu0 %v2010_v17 }
  0x35   : > { %2013 = vmatpush3.bf16.msra.mxu0 %v2010_v17  ;;  %v2048_v17 = vpack.c.bf16 %v1131_v16, %v1130_v15 }
  0x36   : > { %1994 = vmatpush1.bf16.msra.mxu1 %v1993_v20  ;;  %v2014_v20 = vpack.c.bf16 %v915_v19, %v914_v18  ;;  %v1132_v18 = vld [vmem:[%s3018_s7 + $0x80] sm:$0xff]  ;;  %v1133_v19 = vld [vmem:[%s3018_s7 + $0x88] sm:$0xff] }
  0x37   : > { %1995 = vmatprep.subr.bf16.mxu1 %v2253_v11 }
  0x38   : > { %2015 = vmatprep.subr.bf16.mxu0 %v2014_v20 }
  0x39   : > { %2017 = vmatpush3.bf16.msra.mxu0 %v2014_v20  ;;  %v2051_v20 = vpack.c.bf16 %v1133_v19, %v1132_v18 }
  0x3a   : > { %1997 = vmatpush1.bf16.msra.mxu1 %v1996_v23  ;;  %v2018_v23 = vpack.c.bf16 %v917_v22, %v916_v21 }
  0x3b   : > { %1998 = vmatprep.subr.bf16.mxu1 %v2253_v11 }
  0x3c   : > { %2019 = vmatprep.subr.bf16.mxu0 %v2018_v23 }
  0x3d   : > { %2021 = vmatpush3.bf16.msra.mxu0 %v2018_v23  ;;  %v1134_v23 = vld [vmem:[%s3018_s7 + $0x90] sm:$0xff] }
  0x3e   : > { %2000 = vmatpush1.bf16.msra.mxu1 %v1999_v30 }
  0x3f   : > { %2001 = vmatprep.subr.bf16.mxu1 %v2253_v11 }
  0x42   : > { %2003 = vmatpush1.bf16.msra.mxu1 %v2002_v34 }
  0x43   : > { %2004 = vmatprep.subr.bf16.mxu1 %v2253_v11 }
  0x46   : > { %2006 = vmatpush1.bf16.msra.mxu1 %v2005_v38 }
  0x47   : > { %2007 = vmatprep.subr.bf16.mxu1 %v2253_v11 }
  0x4a   : > { %2009 = vmatpush1.bf16.msra.mxu1 %v2008_v55  ;;  %v2577_v55 = vld [vmem:[#allocation2] sm:$0xff] }
  0x4b   : > { %2078 = vmatprep.subr.bf16.mxu1 %v2253_v11 }
  0x96   : > { %v724_v60 = vpop.permute.xlu1 %723 }
  0x9a   : > { %v737_v61 = vpop.permute.xlu1 %736 }
  0x9e   : > { %v750_v62 = vpop.permute.xlu1 %749 }
  0xa2   : > { %v763_v63 = vpop.permute.xlu1 %762 }
  0xfb   : > { %v1918_v25 = vpop.f32.mrb[0].mxu1 }
  0xfc   : > { %v2466_v28 = vadd.f32 %v1918_v25, %v1844_v24  ;;  %v661_v29 = vpop.f32.mrb[1].mxu1  ;;  %v919_v25 = vld [vmem:[%s3014_s6 + $0x38] sm:$0xff] }
  0xfd   : > { %v2468_v31 = vadd.f32 %v1844_v24, %v661_v29  ;;  %v918_v24 = vld [vmem:[%s3014_s6 + $0x30] sm:$0xff]  ;;  %v1850_v29 = vld [vmem:[%s3015_s4] ss:$0 sm:$0xff]  ;;  %s3021_s4 = smov 48   ;;  %s568_s6 = scalar_lea.vmem [#allocation5], %s1841_s23 }
  0xfe   : > { %675 = vst.msk [vmem:[#allocation2 + $0x16] sm:$0xff] %vm670_vm1, %v2466_v28  ;;  %772 = vst.msk [vmem:[#allocation4 + $0x9] sm:$0xff] %vm670_vm1, %v2466_v28  ;;  %v2022_v26 = vpack.c.bf16 %v919_v25, %v918_v24  ;;  %v1135_v24 = vld [vmem:[%s3018_s7 + $0x98] sm:$0xff] }
  0xff   : > { %776 = vst.msk [vmem:[#allocation4 + $0xa] sm:$0x80] %vm775_vm4, %v2466_v28  ;;  %v2054_v25 = vpack.c.bf16 %v1135_v24, %v1134_v23 }
 0x100   : > { %674 = vst.msk [vmem:[#allocation2 + $0xe] sm:$0xff] %vm670_vm1, %v2468_v31  ;;  %771 = vst.msk [vmem:[#allocation4 + $0x1] sm:$0xff] %vm670_vm1, %v2468_v31  ;;  %2023 = vmatprep.subr.bf16.mxu0 %v2022_v26 }
 0x101   : > { %774 = vst.msk [vmem:[#allocation4] sm:$0x1] %vm773_vm5, %v2468_v31  ;;  %2025 = vmatpush3.bf16.msra.mxu0 %v2022_v26  ;;  %v1136_v26 = vld [vmem:[%s3018_s7 + $0xa0] sm:$0xff] }
 0x102   : > { %2026 = vmatprep.subr.bf16.mxu0 %v2253_v11 }
 0x105   : > { %v677_v37 = vld [vmem:[#allocation2 + $0x16] sm:$0xff]  ;;  %v780_v39 = vld [vmem:[#allocation4 + $0x9] sm:$0xff] }
 0x106   : > { %679 = vst.msk [vmem:[#allocation3 + $0x10] sm:$0xff] %vm670_vm1, %v677_v37  ;;  %v784_v46 = vld [vmem:[#allocation4 + $0xa] sm:$0xff] }
 0x107   : > { %v778_v41 = vld [vmem:[#allocation4 + $0x8] sm:$0xff]  ;;  %v681_v56 = vld [vmem:[#allocation2 + $0x14] sm:$0xff] }
 0x108   : > { %v777_v40 = vld [vmem:[#allocation4] sm:$0xff]  ;;  %v706_v42 = vld [vmem:[#allocation2 + $0x8] sm:$0xff]  ;;  %v782_v45 = vmax.f32 %v778_v41, %v780_v39  ;;  %v694_v57 = vld [vmem:[#allocation2 + $0x12] sm:$0xff] }
 0x109   : > { %v680_v43 = vld [vmem:[#allocation2 + $0xc] sm:$0xff]  ;;  %710 = vrot.lane.b32.xlu1 %v706_v42, %s2980_s25  ;;  %v779_v47 = vld [vmem:[#allocation4 + $0x1] sm:$0xff] }
 0x10a   : > { %v693_v44 = vld [vmem:[#allocation2 + $0xa] sm:$0xff]  ;;  %684 = vrot.lane.b32.xlu0 %v680_v43, %s2982_s22  ;;  %v781_v48 = vmax.f32 %v777_v40, %v779_v47  ;;  %v786_v51 = vmax.f32 %v782_v45, %v784_v46  ;;  %v783_v52 = vld [vmem:[#allocation4 + $0x2] sm:$0xff] }
 0x10b   : > { %1003 = vst.msk [vmem:[#allocation2 + $0x8] sm:$0x3f] %vm672_vm2, %v2248_v1  ;;  %v720_v49 = vld [vmem:[#allocation2 + $0xe] sm:$0xff] }
 0x10c   : > { %678 = vst.msk [vmem:[#allocation3] sm:$0xff] %vm670_vm1, %v720_v49  ;;  %v785_v54 = vmax.f32 %v781_v48, %v783_v52  ;;  %788 = vst.msk [vmem:[#allocation3 + $0x18] sm:$0xff] %vm670_vm1, %v786_v51  ;;  %v707_v59 = vld [vmem:[#allocation2 + $0x10] sm:$0xff] }
 0x10d   : > { %738 = vrot.lane.b32.xlu1 %v680_v43, %s2986_s29  ;;  %s3017_s29 = smov 80  }
 0x10e   : > { %697 = vrot.lane.b32.xlu0 %v693_v44, %s2984_s21  ;;  %787 = vst.msk [vmem:[#allocation3 + $0x8] sm:$0xff] %vm670_vm1, %v785_v54 }
 0x111   : > { %764 = vrot.lane.b32.xlu1 %v706_v42, %s3011_s24 }
 0x112   : > { %686 = vrot.lane.b32.xlu0 %v681_v56, %s2982_s22  ;;  %v1046_v27 = vld [vmem:[#allocation2 + $0x6] sm:$0xff]  ;;  %s3019_s22 = smov 32  }
 0x113   : > { %v792_v8 = vld [vmem:[#allocation3 + $0x18] sm:$0xff]  ;;  %v1058_v53 = vld [vmem:[#allocation2 + $0x4] sm:$0xff] }
 0x114   : > { %v1070_v54 = vld [vmem:[#allocation2 + $0x2] sm:$0xff] }
 0x115   : > { %v790_v58 = vld [vmem:[#allocation3 + $0x8] sm:$0xff]  ;;  %1050 = vrot.lane.b32.xlu1 %v1046_v27, %s3012_s26  ;;  %1330 = vst.msk [vmem:[#allocation2] sm:$0xff] %vm670_vm1, %v2248_v1  ;;  %v1116_v56 = vld [vmem:[%s3018_s7] sm:$0xff] }
 0x116   : > { %699 = vrot.lane.b32.xlu0 %v694_v57, %s2984_s21  ;;  %1848 = vmatprep.mubr.msk.f32.mxu1 %vm670_vm1, %v790_v58  ;;  %v1117_v57 = vld [vmem:[%s3018_s7 + $0x8] sm:$0xff]  ;;  %v1118_v58 = vld [vmem:[%s3018_s7 + $0x10] sm:$0xff]  ;;  %s3020_s21 = smov 16  }
 0x117   : > { %v1137_v27 = vld [vmem:[%s3018_s7 + $0xa8] sm:$0xff] }
 0x119   : > { %1062 = vrot.lane.b32.xlu1 %v1058_v53, %s3017_s29 }
 0x11a   : > { %712 = vrot.lane.b32.xlu0 %v707_v59, %s2980_s25  ;;  %v2027_v59 = vpack.c.bf16 %v1117_v57, %v1116_v56  ;;  %s2911_s25 = scalar_lea.sflag [#allocation6], %s566_s3 }
 0x11d   : > { %1074 = vrot.lane.b32.xlu1 %v1070_v54, %s3013_s1 }
 0x11e   : > { %725 = vrot.lane.b32.xlu0 %v720_v49, %s3012_s26 }
 0x122   : > { %751 = vrot.lane.b32.xlu0 %v693_v44, %s3013_s1 }
 0x17b   : > { %v711_v3 = vpop.permute.xlu1 %710 }
 0x17c   : > { %v685_v0 = vpop.permute.xlu0 %684 }
 0x17d   : > { %691 = vst.msk [vmem:[#allocation3] sm:$0xff] %vm690_vm6, %v685_v0 }
 0x17f   : > { %v739_v9 = vpop.permute.xlu1 %738 }
 0x180   : > { %v698_v2 = vpop.permute.xlu0 %697 }
 0x181   : > { %704 = vst.msk [vmem:[#allocation3] sm:$0xff] %vm703_vm7, %v698_v2  ;;  %v1122_v2 = vld [vmem:[%s3018_s7 + $0x30] sm:$0xff] }
 0x182   : > { %717 = vst.msk [vmem:[#allocation3] sm:$0xff] %vm716_vm8, %v711_v3  ;;  %v1123_v3 = vld [vmem:[%s3018_s7 + $0x38] sm:$0xff] }
 0x183   : > { %730 = vst.msk [vmem:[#allocation3] sm:$0xff] %vm729_vm9, %v724_v60  ;;  %v765_v13 = vpop.permute.xlu1 %764  ;;  %v1119_v60 = vld [vmem:[%s3018_s7 + $0x18] sm:$0xff] }
 0x184   : > { %743 = vst.msk [vmem:[#allocation3] sm:$0xff] %vm742_vm10, %v737_v61  ;;  %v687_v4 = vpop.permute.xlu0 %686  ;;  %v2030_v61 = vpack.c.bf16 %v1119_v60, %v1118_v58  ;;  %v1241_v58 = vld [vmem:[%s2962_s10] sm:$0xff]  ;;  %v1243_v60 = vld [vmem:[%s2962_s10 + $0x10] sm:$0xff] }
 0x185   : > { %756 = vst.msk [vmem:[#allocation3] sm:$0xff] %vm755_vm11, %v750_v62  ;;  %v1120_v62 = vld [vmem:[%s3018_s7 + $0x20] sm:$0xff] }
 0x186   : > { %692 = vst.msk [vmem:[#allocation3 + $0x10] sm:$0xff] %vm690_vm6, %v687_v4  ;;  %v2036_v4 = vpack.c.bf16 %v1123_v3, %v1122_v2  ;;  %v1246_v2 = vld [vmem:[%s2962_s10 + $0x28] sm:$0xff] }
 0x187   : > { %769 = vst.msk [vmem:[#allocation3] sm:$0xff] %vm768_vm12, %v763_v63  ;;  %v1121_v63 = vld [vmem:[%s3018_s7 + $0x28] sm:$0xff] }
 0x188   : > { %v700_v5 = vpop.permute.xlu0 %699  ;;  %v2033_v0 = vpack.c.bf16 %v1121_v63, %v1120_v62  ;;  %v1244_v62 = vld [vmem:[%s2962_s10 + $0x18] sm:$0xff] }
 0x189   : > { %705 = vst.msk [vmem:[#allocation3 + $0x10] sm:$0xff] %vm703_vm7, %v700_v5  ;;  %v1124_v5 = vld [vmem:[%s3018_s7 + $0x40] sm:$0xff]  ;;  %v2066_v63 = vpack.c.bf16 %v1244_v62, %v1243_v60  ;;  %v1459_v60 = vld [vmem:[%s2963_s11 + $0x88] sm:$0xff] }
 0x18c   : > { %v713_v6 = vpop.permute.xlu0 %712 }
 0x18d   : > { %718 = vst.msk [vmem:[#allocation3 + $0x10] sm:$0xff] %vm716_vm8, %v713_v6  ;;  %v1125_v6 = vld [vmem:[%s3018_s7 + $0x48] sm:$0xff] }
 0x18e   : > { %v789_v7 = vld [vmem:[#allocation3] sm:$0xff] }
 0x18f   : > { %882 = vmatmul.mubr.f32.vlgmr.msra.gmra.mrb[2].mxu1 %v789_v7  ;;  %v2039_v7 = vpack.c.bf16 %v1125_v6, %v1124_v5  ;;  %v1248_v5 = vld [vmem:[%s2962_s10 + $0x38] sm:$0xff] }
 0x190   : > { %1849 = vmatprep.mubr.msk.f32.mxu1 %vm670_vm1, %v792_v8  ;;  %v726_v10 = vpop.permute.xlu0 %725  ;;  %v1126_v8 = vld [vmem:[%s3018_s7 + $0x50] sm:$0xff] }
 0x191   : > { %731 = vst.msk [vmem:[#allocation3 + $0x10] sm:$0xff] %vm729_vm9, %v726_v10 }
 0x192   : > { %744 = vst.msk [vmem:[#allocation3 + $0x10] sm:$0xff] %vm742_vm10, %v739_v9  ;;  %v1127_v9 = vld [vmem:[%s3018_s7 + $0x58] sm:$0xff] }
 0x193   : > { %v2042_v10 = vpack.c.bf16 %v1127_v9, %v1126_v8  ;;  %v1856_v8 = vld [vmem:[%s2960_s8] ss:$0 sm:$0xff] }
 0x194   : > { %v752_v12 = vpop.permute.xlu0 %751 }
 0x195   : > { %757 = vst.msk [vmem:[#allocation3 + $0x10] sm:$0xff] %vm755_vm11, %v752_v12  ;;  %v1128_v12 = vld [vmem:[%s3018_s7 + $0x60] sm:$0xff] }
 0x196   : > { %770 = vst.msk [vmem:[#allocation3 + $0x10] sm:$0xff] %vm768_vm12, %v765_v13  ;;  %v1129_v13 = vld [vmem:[%s3018_s7 + $0x68] sm:$0xff] }
 0x19d   : > { %v791_v14 = vld [vmem:[#allocation3 + $0x10] sm:$0xff] }
 0x19e   : > { %887 = vmatmul.mubr.f32.gmra.mrb[4].mxu1 %v791_v14  ;;  %v2045_v14 = vpack.c.bf16 %v1129_v13, %v1128_v12 }
 0x262   : > { %v883_v30 = vpop.f32.mrb[2].mxu1 }
 0x263   : > { %v899_v33 = vmul.f32 %v1850_v29, %v883_v30  ;;  %v885_v34 = vpop.f32.mrb[3].mxu1 }
 0x265   : > { %v908_v35 = vadd.f32 %v1851_v32, %v899_v33 }
 0x267   : > { %v910_v36 = vmax.f32 %v908_v35, 0.0 }
 0x269   : > { %1094 = vst.msk [vmem:[#allocation4 + $0x1] sm:$0xff] %vm920_vm13, %v910_v36  ;;  %1935 = vmatprep.mubr.msk.f32.mxu0 %vm920_vm13, %v910_v36 }
 0x26a   : > { %1097 = vst.msk [vmem:[#allocation4] sm:$0x1] %vm1096_vm14, %v910_v36  ;;  %v1138_v36 = vld [vmem:[%s3018_s7 + $0xb0] sm:$0xff] }
 0x270   : > { %v1102_v43 = vld [vmem:[#allocation4 + $0x1] sm:$0xff] }
 0x271   : > { %v888_v37 = vpop.f32.mrb[4].mxu1  ;;  %v1100_v42 = vld [vmem:[#allocation4] sm:$0xff] }
 0x272   : > { %v900_v38 = vmul.f32 %v1850_v29, %v888_v37  ;;  %v890_v39 = vpop.f32.mrb[5].mxu1  ;;  %v1104_v44 = vmax.f32 %v1100_v42, %v1102_v43  ;;  %v2057_v29 = vpack.c.bf16 %v1137_v27, %v1136_v26  ;;  %v1139_v37 = vld [vmem:[%s3018_s7 + $0xb8] sm:$0xff]  ;;  %s1775_s7 = sshll.u32 %s568_s6, 4  ;;  %s2902_s7 = int_to_ptr.vmem [resolvable:$true] %s1775_s7 }
 0x273   : > { %s2184_s5 = scalar_lea.vmem %s2902_s7, 256 }
 0x274   : > { %v909_v40 = vadd.f32 %v1851_v32, %v900_v38  ;;  %v2060_v38 = vpack.c.bf16 %v1139_v37, %v1138_v36  ;;  %v1442_v36 = vld [vmem:[%s2963_s11] sm:$0xff]  ;;  %v1443_v37 = vld [vmem:[%s2963_s11 + $0x8] sm:$0xff]  ;;  %p2185_p11 = scmp.ne.s32.totalorder %s2902_s7, %s2184_s5 }
 0x276   : > { %v911_v41 = vmax.f32 %v909_v40, 0.0  ;;  %p2186_p12 = pnand %p2185_p11, %p2393_p5 }
 0x278   : > { %1095 = vst.msk [vmem:[#allocation4 + $0x9] sm:$0xff] %vm920_vm13, %v911_v41  ;;  %1936 = vmatmul.mubr.msk.f32.vlgmr.msra.gmra.mrb[0].mxu0 %vm920_vm13, %v911_v41  ;;  %p2187_p13 = pneg %p2186_p12 }
 0x279   : > { %1099 = vst.msk [vmem:[#allocation4 + $0xa] sm:$0x80] %vm1098_vm15, %v911_v41  ;;  %2028 = vmatpush1.bf16.msra.mxu0 %v2027_v59  ;;  %v1051_v41 = vpop.permute.xlu1 %1050  ;;  %v1242_v59 = vld [vmem:[%s2962_s10 + $0x8] sm:$0xff] }
 0x27a   : > { %2029 = vmatprep.subr.bf16.mxu0 %v2253_v11 }
 0x27d   : > { %2031 = vmatpush1.bf16.msra.mxu0 %v2030_v61  ;;  %v1063_v42 = vpop.permute.xlu1 %1062  ;;  %v2062_v61 = vpack.c.bf16 %v1242_v59, %v1241_v58  ;;  %v1458_v59 = vld [vmem:[%s2963_s11 + $0x80] sm:$0xff] }
 0x27e   : > { %2032 = vmatprep.subr.bf16.mxu0 %v2253_v11 }
 0x27f   : > { %v1106_v45 = vld [vmem:[#allocation4 + $0x2] sm:$0xff] }
 0x280   : > { %v1101_v46 = vld [vmem:[#allocation4 + $0x8] sm:$0xff]  ;;  %v1108_v47 = vmax.f32 %v1104_v44, %v1106_v45 }
 0x281   : > { %v1103_v48 = vld [vmem:[#allocation4 + $0x9] sm:$0xff]  ;;  %2034 = vmatpush1.bf16.msra.mxu0 %v2033_v0  ;;  %v1075_v43 = vpop.permute.xlu1 %1074  ;;  %v1245_v0 = vld [vmem:[%s2962_s10 + $0x20] sm:$0xff] }
 0x282   : > { %v1105_v49 = vmax.f32 %v1101_v46, %v1103_v48  ;;  %v1107_v50 = vld [vmem:[#allocation4 + $0xa] sm:$0xff]  ;;  %1110 = vst.msk [vmem:[#allocation3 + $0x8] sm:$0xff] %vm920_vm13, %v1108_v47  ;;  %2035 = vmatprep.subr.bf16.mxu0 %v2253_v11  ;;  %v2070_v3 = vpack.c.bf16 %v1246_v2, %v1245_v0  ;;  %v1461_v2 = vld [vmem:[%s2963_s11 + $0x98] sm:$0xff] }
 0x283   : > { %v1460_v0 = vld [vmem:[%s2963_s11 + $0x90] sm:$0xff] }
 0x284   : > { %v1109_v51 = vmax.f32 %v1105_v49, %v1107_v50 }
 0x285   : > { %2037 = vmatpush1.bf16.msra.mxu0 %v2036_v4  ;;  %v1247_v4 = vld [vmem:[%s2962_s10 + $0x30] sm:$0xff] }
 0x286   : > { %1111 = vst.msk [vmem:[#allocation3 + $0x18] sm:$0xff] %vm920_vm13, %v1109_v51  ;;  %2038 = vmatprep.subr.bf16.mxu0 %v2253_v11  ;;  %v2074_v6 = vpack.c.bf16 %v1248_v5, %v1247_v4  ;;  %v1462_v4 = vld [vmem:[%s2963_s11 + $0xa0] sm:$0xff]  ;;  %v1463_v5 = vld [vmem:[%s2963_s11 + $0xa8] sm:$0xff] }
 0x289   : > { %v1113_v52 = vld [vmem:[#allocation3 + $0x8] sm:$0xff]  ;;  %2040 = vmatpush1.bf16.msra.mxu0 %v2039_v7 }
 0x28a   : > { %1854 = vmatprep.mubr.msk.f32.mxu0 %vm920_vm13, %v1113_v52  ;;  %2041 = vmatprep.subr.bf16.mxu0 %v2253_v11 }
 0x28d   : > { %2043 = vmatpush1.bf16.msra.mxu0 %v2042_v10  ;;  %v1115_v52 = vld [vmem:[#allocation3 + $0x18] sm:$0xff]  ;;  %v1857_v10 = vld [vmem:[%s2961_s9] ss:$0 sm:$0xff] }
 0x28e   : > { %2044 = vmatprep.subr.bf16.mxu0 %v2253_v11 }
 0x291   : > { %2046 = vmatpush1.bf16.msra.mxu0 %v2045_v14 }
 0x292   : > { %2047 = vmatprep.subr.bf16.mxu0 %v2253_v11 }
 0x295   : > { %2049 = vmatpush1.bf16.msra.mxu0 %v2048_v17 }
 0x296   : > { %2050 = vmatprep.subr.bf16.mxu0 %v2253_v11 }
 0x299   : > { %2052 = vmatpush1.bf16.msra.mxu0 %v2051_v20 }
 0x29a   : > { %2053 = vmatprep.subr.bf16.mxu0 %v2253_v11 }
 0x29d   : > { %2055 = vmatpush1.bf16.msra.mxu0 %v2054_v25 }
 0x29e   : > { %2056 = vmatprep.subr.bf16.mxu0 %v2253_v11 }
 0x2a1   : > { %2058 = vmatpush1.bf16.msra.mxu0 %v2057_v29 }
 0x2a2   : > { %2059 = vmatprep.subr.bf16.mxu0 %v2253_v11 }
 0x2a5   : > { %2061 = vmatpush1.bf16.msra.mxu0 %v2060_v38  ;;  %v1444_v38 = vld [vmem:[%s2963_s11 + $0x10] sm:$0xff] }
 0x2a6   : > { %2063 = vmatprep.subr.bf16.mxu0 %v2062_v61 }
 0x34b   : > { %v1937_v21 = vpop.f32.mrb[0].mxu0 }
 0x34c   : > { %1005 = vst.msk [vmem:[#allocation2 + $0x16] sm:$0xff] %vm670_vm1, %v1937_v21  ;;  %v993_v22 = vpop.f32.mrb[1].mxu0 }
 0x34d   : > { %1004 = vst.msk [vmem:[#allocation2 + $0xe] sm:$0xff] %vm670_vm1, %v993_v22 }
 0x353   : > { %v1007_v30 = vld [vmem:[#allocation2 + $0x16] sm:$0xff] }
 0x354   : > { %v1022_v32 = vld [vmem:[#allocation2 + $0xa] sm:$0xff]  ;;  %1009 = vst.msk [vmem:[#allocation3 + $0x10] sm:$0xff] %vm670_vm1, %v1007_v30  ;;  %v1011_v39 = vld [vmem:[#allocation2 + $0x14] sm:$0xff] }
 0x355   : > { %v1010_v33 = vld [vmem:[#allocation2 + $0xc] sm:$0xff]  ;;  %1026 = vrot.lane.b32.xlu1 %v1022_v32, %s3019_s22 }
 0x356   : > { %v1034_v34 = vld [vmem:[#allocation2 + $0x8] sm:$0xff]  ;;  %1014 = vrot.lane.b32.xlu0 %v1010_v33, %s3020_s21  ;;  %v1035_v40 = vld [vmem:[#allocation2 + $0x10] sm:$0xff] }
 0x357   : > { %1331 = vst.msk [vmem:[#allocation2 + $0x8] sm:$0x3f] %vm672_vm2, %v2248_v1  ;;  %v1047_v35 = vld [vmem:[#allocation2 + $0xe] sm:$0xff] }
 0x358   : > { %1008 = vst.msk [vmem:[#allocation3] sm:$0xff] %vm670_vm1, %v1047_v35  ;;  %v1023_v1 = vld [vmem:[#allocation2 + $0x12] sm:$0xff] }
 0x359   : > { %1086 = vrot.lane.b32.xlu1 %v2577_v55, %s3011_s24 }
 0x35a   : > { %1038 = vrot.lane.b32.xlu0 %v1034_v34, %s3021_s4 }
 0x35d   : > { %1064 = vrot.lane.b32.xlu1 %v1010_v33, %s3017_s29 }
 0x35e   : > { %1016 = vrot.lane.b32.xlu0 %v1011_v39, %s3020_s21  ;;  %v1374_v7 = vld [vmem:[#allocation2 + $0x6] sm:$0xff]  ;;  %v2079_v39 = vpack.c.bf16 %v1443_v37, %v1442_v36 }
 0x360   : > { %2080 = vmatpush1.bf16.msra.mxu1 %v2079_v39 }
 0x361   : > { %1088 = vrot.lane.b32.xlu1 %v1034_v34, %s3011_s24  ;;  %v1386_v34 = vld [vmem:[#allocation2 + $0x4] sm:$0xff]  ;;  %2081 = vmatprep.subr.bf16.mxu1 %v2253_v11 }
 0x362   : > { %1028 = vrot.lane.b32.xlu0 %v1023_v1, %s3019_s22  ;;  %v1445_v1 = vld [vmem:[%s2963_s11 + $0x18] sm:$0xff] }
 0x365   : > { %1378 = vrot.lane.b32.xlu1 %v1374_v7, %s3012_s26 }
 0x366   : > { %1040 = vrot.lane.b32.xlu0 %v1035_v40, %s3021_s4  ;;  %v2082_v40 = vpack.c.bf16 %v1445_v1, %v1444_v38 }
 0x368   : > { %2083 = vmatpush1.bf16.msra.mxu1 %v2082_v40  ;;  %v1670_v40 = vld [vmem:[%s2969_s17] sm:$0xff] }
 0x369   : > { %1390 = vrot.lane.b32.xlu1 %v1386_v34, %s3017_s29  ;;  %2084 = vmatprep.subr.bf16.mxu1 %v2253_v11 }
 0x36a   : > { %1052 = vrot.lane.b32.xlu0 %v1047_v35, %s3012_s26  ;;  %v1398_v35 = vld [vmem:[#allocation2 + $0x2] sm:$0xff] }
 0x36d   : > { %1402 = vrot.lane.b32.xlu1 %v1398_v35, %s3013_s1 }
 0x36e   : > { %1076 = vrot.lane.b32.xlu0 %v1022_v32, %s3013_s1 }
 0x3c7   : > { %v1027_v44 = vpop.permute.xlu1 %1026 }
 0x3c8   : > { %v1015_v45 = vpop.permute.xlu0 %1014 }
 0x3c9   : > { %1020 = vst.msk [vmem:[#allocation3] sm:$0xff] %vm690_vm6, %v1015_v45  ;;  %v1449_v45 = vld [vmem:[%s2963_s11 + $0x38] sm:$0xff] }
 0x3ca   : > { %1032 = vst.msk [vmem:[#allocation3] sm:$0xff] %vm703_vm7, %v1027_v44  ;;  %v1448_v44 = vld [vmem:[%s2963_s11 + $0x30] sm:$0xff] }
 0x3cb   : > { %v1087_v47 = vpop.permute.xlu1 %1086 }
 0x3cc   : > { %v1039_v46 = vpop.permute.xlu0 %1038 }
 0x3cd   : > { %1044 = vst.msk [vmem:[#allocation3] sm:$0xff] %vm716_vm8, %v1039_v46  ;;  %v2088_v46 = vpack.c.bf16 %v1449_v45, %v1448_v44  ;;  %v1674_v44 = vld [vmem:[%s2969_s17 + $0x20] sm:$0xff]  ;;  %v1675_v45 = vld [vmem:[%s2969_s17 + $0x28] sm:$0xff] }
 0x3ce   : > { %1056 = vst.msk [vmem:[#allocation3] sm:$0xff] %vm729_vm9, %v1051_v41  ;;  %v1446_v41 = vld [vmem:[%s2963_s11 + $0x20] sm:$0xff] }
 0x3cf   : > { %1068 = vst.msk [vmem:[#allocation3] sm:$0xff] %vm742_vm10, %v1063_v42  ;;  %v1065_v53 = vpop.permute.xlu1 %1064  ;;  %v1447_v42 = vld [vmem:[%s2963_s11 + $0x28] sm:$0xff] }
 0x3d0   : > { %1080 = vst.msk [vmem:[#allocation3] sm:$0xff] %vm755_vm11, %v1075_v43  ;;  %v1017_v48 = vpop.permute.xlu0 %1016  ;;  %v2085_v43 = vpack.c.bf16 %v1447_v42, %v1446_v41  ;;  %v1671_v41 = vld [vmem:[%s2969_s17 + $0x8] sm:$0xff] }
 0x3d1   : > { %1092 = vst.msk [vmem:[#allocation3] sm:$0xff] %vm768_vm12, %v1087_v47  ;;  %v1450_v47 = vld [vmem:[%s2963_s11 + $0x40] sm:$0xff]  ;;  %v2118_v42 = vpack.c.bf16 %v1671_v41, %v1670_v40 }
 0x3d2   : > { %1021 = vst.msk [vmem:[#allocation3 + $0x10] sm:$0xff] %vm690_vm6, %v1017_v48  ;;  %2086 = vmatpush1.bf16.msra.mxu1 %v2085_v43  ;;  %v1451_v48 = vld [vmem:[%s2963_s11 + $0x48] sm:$0xff]  ;;  %v1672_v43 = vld [vmem:[%s2969_s17 + $0x10] sm:$0xff] }
 0x3d3   : > { %v1089_v56 = vpop.permute.xlu1 %1088  ;;  %2087 = vmatprep.subr.bf16.mxu1 %v2253_v11 }
 0x3d4   : > { %v1029_v49 = vpop.permute.xlu0 %1028 }
 0x3d5   : > { %1033 = vst.msk [vmem:[#allocation3 + $0x10] sm:$0xff] %vm703_vm7, %v1029_v49  ;;  %v2091_v49 = vpack.c.bf16 %v1451_v48, %v1450_v47  ;;  %v1676_v47 = vld [vmem:[%s2969_s17 + $0x30] sm:$0xff]  ;;  %v1677_v48 = vld [vmem:[%s2969_s17 + $0x38] sm:$0xff] }
 0x3d6   : > { %2089 = vmatpush1.bf16.msra.mxu1 %v2088_v46  ;;  %v2126_v46 = vpack.c.bf16 %v1675_v45, %v1674_v44 }
 0x3d7   : > { %2090 = vmatprep.subr.bf16.mxu1 %v2253_v11 }
 0x3d8   : > { %v1041_v50 = vpop.permute.xlu0 %1040  ;;  %v1112_v51 = vld [vmem:[#allocation3] sm:$0xff] }
 0x3d9   : > { %1045 = vst.msk [vmem:[#allocation3 + $0x10] sm:$0xff] %vm716_vm8, %v1041_v50  ;;  %1211 = vmatmul.mubr.f32.vlgmr.msra.gmra.mrb[2].mxu0 %v1112_v51  ;;  %v1452_v50 = vld [vmem:[%s2963_s11 + $0x50] sm:$0xff]  ;;  %v1453_v51 = vld [vmem:[%s2963_s11 + $0x58] sm:$0xff] }
 0x3da   : > { %1855 = vmatprep.mubr.msk.f32.mxu0 %vm920_vm13, %v1115_v52  ;;  %2065 = vmatpush3.bf16.msra.mxu0 %v2062_v61  ;;  %v2094_v52 = vpack.c.bf16 %v1453_v51, %v1452_v50  ;;  %v2103_v61 = vpack.c.bf16 %v1459_v60, %v1458_v59  ;;  %v1867_v59 = vld [vmem:[%s2968_s16] ss:$0 sm:$0xff] }
 0x3db   : > { %2067 = vmatprep.subr.bf16.mxu0 %v2066_v63  ;;  %2092 = vmatpush1.bf16.msra.mxu1 %v2091_v49  ;;  %v2130_v49 = vpack.c.bf16 %v1677_v48, %v1676_v47  ;;  %v1863_v60 = vld [vmem:[%s2965_s13] ss:$0 sm:$0xff] }
 0x3dc   : > { %v1053_v54 = vpop.permute.xlu0 %1052  ;;  %2093 = vmatprep.subr.bf16.mxu1 %v2253_v11 }
 0x3dd   : > { %1057 = vst.msk [vmem:[#allocation3 + $0x10] sm:$0xff] %vm729_vm9, %v1053_v54  ;;  %v1455_v54 = vld [vmem:[%s2963_s11 + $0x68] sm:$0xff] }
 0x3de   : > { %1069 = vst.msk [vmem:[#allocation3 + $0x10] sm:$0xff] %vm742_vm10, %v1065_v53  ;;  %2069 = vmatpush3.bf16.msra.mxu0 %v2066_v63  ;;  %v1454_v53 = vld [vmem:[%s2963_s11 + $0x60] sm:$0xff] }
 0x3df   : > { %2071 = vmatprep.subr.bf16.mxu0 %v2070_v3  ;;  %2095 = vmatpush1.bf16.msra.mxu1 %v2094_v52 }
 0x3e0   : > { %v1077_v55 = vpop.permute.xlu0 %1076  ;;  %2096 = vmatprep.subr.bf16.mxu1 %v2253_v11 }
 0x3e1   : > { %1081 = vst.msk [vmem:[#allocation3 + $0x10] sm:$0xff] %vm755_vm11, %v1077_v55  ;;  %v2097_v55 = vpack.c.bf16 %v1455_v54, %v1454_v53  ;;  %v1862_v53 = vld [vmem:[%s2964_s12] ss:$0 sm:$0xff] }
 0x3e2   : > { %1093 = vst.msk [vmem:[#allocation3 + $0x10] sm:$0xff] %vm768_vm12, %v1089_v56  ;;  %2073 = vmatpush3.bf16.msra.mxu0 %v2070_v3  ;;  %v1456_v56 = vld [vmem:[%s2963_s11 + $0x70] sm:$0xff]  ;;  %v2106_v3 = vpack.c.bf16 %v1461_v2, %v1460_v0 }
 0x3e3   : > { %2075 = vmatprep.subr.bf16.mxu0 %v2074_v6  ;;  %2098 = vmatpush1.bf16.msra.mxu1 %v2097_v55  ;;  %v1866_v55 = vld [vmem:[%s2967_s15] ss:$0 sm:$0xff] }
 0x3e4   : > { %2099 = vmatprep.subr.bf16.mxu1 %v2253_v11 }
 0x3e6   : > { %2077 = vmatpush3.bf16.msra.mxu0 %v2074_v6  ;;  %v2109_v6 = vpack.c.bf16 %v1463_v5, %v1462_v4 }
 0x3e7   : > { %2119 = vmatprep.subr.bf16.mxu0 %v2118_v42 }
 0x3e9   : > { %v1114_v57 = vld [vmem:[#allocation3 + $0x10] sm:$0xff] }
 0x3ea   : > { %1216 = vmatmul.mubr.f32.gmra.mrb[4].mxu0 %v1114_v57  ;;  %v1457_v57 = vld [vmem:[%s2963_s11 + $0x78] sm:$0xff] }
 0x3eb   : > { %v2100_v58 = vpack.c.bf16 %v1457_v57, %v1456_v56 }
 0x3ed   : > { %2101 = vmatpush1.bf16.msra.mxu1 %v2100_v58 }
 0x3ee   : > { %2102 = vmatprep.subr.bf16.mxu1 %v2253_v11 }
 0x3f1   : > { %2104 = vmatpush1.bf16.msra.mxu1 %v2103_v61 }
 0x3f2   : > { %2105 = vmatprep.subr.bf16.mxu1 %v2253_v11 }
 0x3f5   : > { %2107 = vmatpush1.bf16.msra.mxu1 %v2106_v3 }
 0x3f6   : > { %2108 = vmatprep.subr.bf16.mxu1 %v2253_v11 }
 0x3f9   : > { %2110 = vmatpush1.bf16.msra.mxu1 %v2109_v6 }
 0x3fa   : > { %2111 = vmatprep.subr.bf16.mxu1 %v2253_v11 }
 0x4ac   : > { %v1212_v9 = vpop.f32.mrb[2].mxu0 }
 0x4ad   : > { %v1228_v12 = vmul.f32 %v1856_v8, %v1212_v9  ;;  %v1214_v13 = vpop.f32.mrb[3].mxu0 }
 0x4ae   : > { %v1464_v13 = vld [vmem:[%s2963_s11 + $0xb0] sm:$0xff] }
 0x4af   : > { %v1237_v14 = vadd.f32 %v1857_v10, %v1228_v12 }
 0x4b1   : > { %v1239_v15 = vmax.f32 %v1237_v14, 0.0  ;;  %v1465_v14 = vld [vmem:[%s2963_s11 + $0xb8] sm:$0xff] }
 0x4b3   : > { %1422 = vst.msk [vmem:[#allocation4 + $0x1] sm:$0xff] %vm920_vm13, %v1239_v15  ;;  %1954 = vmatprep.mubr.msk.f32.mxu0 %vm920_vm13, %v1239_v15 }
 0x4b4   : > { %1424 = vst.msk [vmem:[#allocation4] sm:$0x1] %vm1096_vm14, %v1239_v15  ;;  %v2112_v15 = vpack.c.bf16 %v1465_v14, %v1464_v13 }
 0x4b6   : > { %2113 = vmatpush1.bf16.msra.mxu1 %v2112_v15 }
 0x4ba   : > { %v1428_v22 = vld [vmem:[#allocation4 + $0x1] sm:$0xff] }
 0x4bb   : > { %v1426_v21 = vld [vmem:[#allocation4] sm:$0xff] }
 0x4bc   : > { %v1430_v23 = vmax.f32 %v1426_v21, %v1428_v22  ;;  %v1379_v22 = vpop.permute.xlu1 %1378 }
 0x4bd   : > { %v1217_v16 = vpop.f32.mrb[4].mxu0 }
 0x4be   : > { %v1229_v17 = vmul.f32 %v1856_v8, %v1217_v16  ;;  %v1219_v18 = vpop.f32.mrb[5].mxu0 }
 0x4bf   : > { %v1565_v18 = vld [vmem:[%s2966_s14] sm:$0xff] }
 0x4c0   : > { %v1238_v19 = vadd.f32 %v1857_v10, %v1229_v17  ;;  %v1410_v10 = vld [vmem:[#allocation2] sm:$0xff] }
 0x4c2   : > { %v1240_v20 = vmax.f32 %v1238_v19, 0.0  ;;  %v1566_v19 = vld [vmem:[%s2966_s14 + $0x8] sm:$0xff] }
 0x4c4   : > { %1423 = vst.msk [vmem:[#allocation4 + $0x9] sm:$0xff] %vm920_vm13, %v1240_v20  ;;  %1955 = vmatmul.mubr.msk.f32.vlgmr.msra.gmra.mrb[6].mxu0 %vm920_vm13, %v1240_v20 }
 0x4c5   : > { %1425 = vst.msk [vmem:[#allocation4 + $0xa] sm:$0x80] %vm1098_vm15, %v1240_v20  ;;  %v2114_v20 = vpack.c.bf16 %v1566_v19, %v1565_v18  ;;  %2121 = vmatpush3.bf16.msra.mxu0 %v2118_v42 }
 0x4c7   : > { %2115 = vmatprep.subr.bf16.mxu1 %v2114_v20 }
 0x4cb   : > { %v1432_v24 = vld [vmem:[#allocation4 + $0x2] sm:$0xff] }
 0x4cc   : > { %v1427_v25 = vld [vmem:[#allocation4 + $0x8] sm:$0xff]  ;;  %v1434_v27 = vmax.f32 %v1430_v23, %v1432_v24  ;;  %v1391_v23 = vpop.permute.xlu1 %1390 }
 0x4cd   : > { %v1429_v26 = vld [vmem:[#allocation4 + $0x9] sm:$0xff] }
 0x4ce   : > { %v1431_v29 = vmax.f32 %v1427_v25, %v1429_v26  ;;  %v1433_v30 = vld [vmem:[#allocation4 + $0xa] sm:$0xff]  ;;  %1436 = vst.msk [vmem:[#allocation3 + $0x8] sm:$0xff] %vm920_vm13, %v1434_v27 }
 0x4d0   : > { %v1435_v32 = vmax.f32 %v1431_v29, %v1433_v30  ;;  %v1403_v24 = vpop.permute.xlu1 %1402 }
 0x4d2   : > { %1437 = vst.msk [vmem:[#allocation3 + $0x18] sm:$0xff] %vm920_vm13, %v1435_v32 }
 0x4d5   : > { %v1439_v33 = vld [vmem:[#allocation3 + $0x8] sm:$0xff] }
 0x4d6   : > { %1860 = vmatprep.mubr.msk.f32.mxu1 %vm920_vm13, %v1439_v33 }
 0x4d9   : > { %v1441_v35 = vld [vmem:[#allocation3 + $0x18] sm:$0xff] }
 0x597   : > { %v1956_v62 = vpop.f32.mrb[6].mxu0 }
 0x598   : > { %1333 = vst.msk [vmem:[#allocation2 + $0x16] sm:$0xff] %vm670_vm1, %v1956_v62  ;;  %v1321_v63 = vpop.f32.mrb[7].mxu0 }
 0x599   : > { %1332 = vst.msk [vmem:[#allocation2 + $0xe] sm:$0xff] %vm670_vm1, %v1321_v63 }
 0x59f   : > { %v1335_v7 = vld [vmem:[#allocation2 + $0x16] sm:$0xff] }
 0x5a0   : > { %v1350_v8 = vld [vmem:[#allocation2 + $0xa] sm:$0xff]  ;;  %1337 = vst.msk [vmem:[#allocation3 + $0x10] sm:$0xff] %vm670_vm1, %v1335_v7  ;;  %v1339_v11 = vld [vmem:[#allocation2 + $0x14] sm:$0xff] }
 0x5a1   : > { %v1338_v9 = vld [vmem:[#allocation2 + $0xc] sm:$0xff]  ;;  %1354 = vrot.lane.b32.xlu1 %v1350_v8, %s3019_s22 }
 0x5a2   : > { %1342 = vrot.lane.b32.xlu0 %v1338_v9, %s3020_s21  ;;  %v1375_v12 = vld [vmem:[#allocation2 + $0xe] sm:$0xff] }
 0x5a3   : > { %1336 = vst.msk [vmem:[#allocation3] sm:$0xff] %vm670_vm1, %v1375_v12  ;;  %v1362_v16 = vld [vmem:[#allocation2 + $0x8] sm:$0xff]  ;;  %v1351_v17 = vld [vmem:[#allocation2 + $0x12] sm:$0xff] }
 0x5a4   : > { %v1363_v21 = vld [vmem:[#allocation2 + $0x10] sm:$0xff] }
 0x5a5   : > { %1414 = vrot.lane.b32.xlu1 %v1410_v10, %s3011_s24 }
 0x5a6   : > { %1366 = vrot.lane.b32.xlu0 %v1362_v16, %s3021_s4 }
 0x5a9   : > { %1392 = vrot.lane.b32.xlu1 %v1338_v9, %s3017_s29 }
 0x5aa   : > { %1344 = vrot.lane.b32.xlu0 %v1339_v11, %s3020_s21 }
 0x5ad   : > { %1416 = vrot.lane.b32.xlu1 %v1362_v16, %s3011_s24  ;;  %s2188_s24 = sshll.u32 %s2257_s0, 4  ;;  %s2189_s24 = int_to_ptr.vmem [resolvable:$false] %s2188_s24 }
 0x5ae   : > { %1356 = vrot.lane.b32.xlu0 %v1351_v17, %s3019_s22  ;;  %p2191_p0 = scmp.lt.s32.totalorder %s2902_s7, %s2189_s24 }
 0x5b2   : > { %1368 = vrot.lane.b32.xlu0 %v1363_v21, %s3021_s4 }
 0x5b6   : > { %1380 = vrot.lane.b32.xlu0 %v1375_v12, %s3012_s26  ;;  %s2190_s26 = scalar_lea.vmem %s2189_s24, 512 }
 0x5b7   : > { %p2192_p1 = scmp.lt.s32.totalorder %s2190_s26, %s2184_s5 }
 0x5b9   : > { %p2193_p2 = por %p2192_p1, %p2191_p0 }
 0x5ba   : > { %1404 = vrot.lane.b32.xlu0 %v1350_v8, %s3013_s1 }
 0x5bb   : > { %p2194_p3 = pnand %p2193_p2, %p2187_p13 }
 0x613   : > { %v1355_v25 = vpop.permute.xlu1 %1354 }
 0x614   : > { %v1343_v26 = vpop.permute.xlu0 %1342 }
 0x615   : > { %1348 = vst.msk [vmem:[#allocation3] sm:$0xff] %vm690_vm6, %v1343_v26 }
 0x616   : > { %1360 = vst.msk [vmem:[#allocation3] sm:$0xff] %vm703_vm7, %v1355_v25 }
 0x617   : > { %v1415_v29 = vpop.permute.xlu1 %1414 }
 0x618   : > { %v1367_v27 = vpop.permute.xlu0 %1366 }
 0x619   : > { %1372 = vst.msk [vmem:[#allocation3] sm:$0xff] %vm716_vm8, %v1367_v27 }
 0x61a   : > { %1384 = vst.msk [vmem:[#allocation3] sm:$0xff] %vm729_vm9, %v1379_v22 }
 0x61b   : > { %1396 = vst.msk [vmem:[#allocation3] sm:$0xff] %vm742_vm10, %v1391_v23  ;;  %v1393_v36 = vpop.permute.xlu1 %1392 }
 0x61c   : > { %1408 = vst.msk [vmem:[#allocation3] sm:$0xff] %vm755_vm11, %v1403_v24  ;;  %v1345_v30 = vpop.permute.xlu0 %1344 }
 0x61d   : > { %1420 = vst.msk [vmem:[#allocation3] sm:$0xff] %vm768_vm12, %v1415_v29 }
 0x61e   : > { %1349 = vst.msk [vmem:[#allocation3 + $0x10] sm:$0xff] %vm690_vm6, %v1345_v30 }
 0x61f   : > { %v1417_v39 = vpop.permute.xlu1 %1416 }
 0x620   : > { %v1357_v32 = vpop.permute.xlu0 %1356 }
 0x621   : > { %1361 = vst.msk [vmem:[#allocation3 + $0x10] sm:$0xff] %vm703_vm7, %v1357_v32 }
 0x624   : > { %v1369_v33 = vpop.permute.xlu0 %1368  ;;  %v1438_v34 = vld [vmem:[#allocation3] sm:$0xff] }
 0x625   : > { %1373 = vst.msk [vmem:[#allocation3 + $0x10] sm:$0xff] %vm716_vm8, %v1369_v33  ;;  %1537 = vmatmul.mubr.f32.vlgmr.msra.gmra.mrb[6].mxu1 %v1438_v34 }
 0x626   : > { %1861 = vmatprep.mubr.msk.f32.mxu1 %vm920_vm13, %v1441_v35  ;;  %2117 = vmatpush3.bf16.msra.mxu1 %v2114_v20 }
 0x628   : > { %v1381_v37 = vpop.permute.xlu0 %1380 }
 0x629   : > { %1385 = vst.msk [vmem:[#allocation3 + $0x10] sm:$0xff] %vm729_vm9, %v1381_v37 }
 0x62a   : > { %1397 = vst.msk [vmem:[#allocation3 + $0x10] sm:$0xff] %vm742_vm10, %v1393_v36 }
 0x62c   : > { %v1405_v38 = vpop.permute.xlu0 %1404 }
 0x62d   : > { %1409 = vst.msk [vmem:[#allocation3 + $0x10] sm:$0xff] %vm755_vm11, %v1405_v38 }
 0x62e   : > { %1421 = vst.msk [vmem:[#allocation3 + $0x10] sm:$0xff] %vm768_vm12, %v1417_v39 }
 0x635   : > { %v1440_v1 = vld [vmem:[#allocation3 + $0x10] sm:$0xff] }
 0x636   : > { %1542 = vmatmul.mubr.f32.gmra.mrb[8].mxu1 %v1440_v1 }
 0x637   : > { %1961 = vmatprep.mubr.msk.f32.mxu1 %vm670_vm1, %v2468_v31  ;;  %v1673_v31 = vld [vmem:[%s2969_s17 + $0x18] sm:$0xff] }
 0x63a   : > { %1962 = vmatmul.mubr.msk.f32.vlgmr.msra.gmra.mrb[10].mxu1 %vm670_vm1, %v2466_v28  ;;  %v2122_v28 = vpack.c.bf16 %v1673_v31, %v1672_v43 }
 0x63c   : > { %2123 = vmatprep.subr.bf16.mxu0 %v2122_v28 }
 0x63d   : > { %2125 = vmatpush3.bf16.msra.mxu0 %v2122_v28 }
 0x63e   : > { %2127 = vmatprep.subr.bf16.mxu0 %v2126_v46 }
 0x641   : > { %2129 = vmatpush3.bf16.msra.mxu0 %v2126_v46 }
 0x642   : > { %2131 = vmatprep.subr.bf16.mxu0 %v2130_v49 }
 0x645   : > { %2133 = vmatpush3.bf16.msra.mxu0 %v2130_v49 }
 0x6f8   : > { %v1538_v50 = vpop.f32.mrb[6].mxu1 }
 0x6f9   : > { %v1540_v51 = vpop.f32.mrb[7].mxu1  ;;  %v1554_v57 = vmul.f32 %v1862_v53, %v1538_v50 }
 0x6fb   : > { %v1563_v3 = vadd.f32 %v1863_v60, %v1554_v57 }
 0x709   : > { %v1543_v52 = vpop.f32.mrb[8].mxu1 }
 0x70a   : > { %v1545_v54 = vpop.f32.mrb[9].mxu1  ;;  %v1555_v56 = vmul.f32 %v1862_v53, %v1543_v52 }
 0x70c   : > { %v1564_v0 = vadd.f32 %v1863_v60, %v1555_v56 }
 0x70d   : > { %v1963_v58 = vpop.f32.mrb[10].mxu1 }
 0x70e   : > { %v1656_v61 = vmul.f32 %v1963_v58, %v1866_v55  ;;  %v1639_v62 = vpop.f32.mrb[11].mxu1 }
 0x70f   : > { %v1655_v63 = vmul.f32 %v1866_v55, %v1639_v62 }
 0x710   : > { %v1665_v2 = vadd.f32 %v1867_v59, %v1656_v61 }
 0x711   : > { %v1664_v4 = vadd.f32 %v1867_v59, %v1655_v63 }
 0x712   : > { %v1667_v5 = vadd.f32 %v1665_v2, %v1564_v0 }
 0x713   : > { %v1666_v6 = vadd.f32 %v1664_v4, %v1563_v3 }
 0x714   : > { %v1669_v8 = vmax.f32 %v1667_v5, 0.0 }
 0x715   : > { %v1668_v7 = vmax.f32 %v1666_v6, 0.0 }
 0x717   : > { %1980 = vmatprep.mubr.msk.f32.mxu0 %vm920_vm13, %v1668_v7 }
 0x718   : > { %1981 = vmatmul.mubr.msk.f32.vlgmr.msra.gmra.mrb[8].mxu0 %vm920_vm13, %v1669_v8 }
 0x7eb   : > { %v1982_v9 = vpop.f32.mrb[8].mxu0 }
 0x7ec   : > { %1760 = vst.msk [vmem:[%s568_s6 + $0x8] sm:$0xff] %vm670_vm1, %v1982_v9  ;;  %v1750_v10 = vpop.f32.mrb[9].mxu0 }
 0x7ed   : > { %1759 = vst.msk [vmem:[%s568_s6] sm:$0xff] %vm670_vm1, %v1750_v10 }
 0x7ee   : > { %2197 = shalt.err (!%p2194_p3)
}
 0x7ef   : > { %s2198_s1 = scalar_lea.hbm %s2907_s20, 256  ;;  %s2202_s21 = scalar_lea.hbm %s2970_s18, 512 }
 0x7f0   : > { %p2199_p4 = scmp.ne.s32.totalorder %s2907_s20, %s2198_s1  ;;  %p2203_p9 = scmp.lt.u32.totalorder %s2907_s20, %s2970_s18 }
 0x7f1   : > { %p2204_p10 = scmp.lt.u32.totalorder %s2202_s21, %s2198_s1  ;;  %p2206_p12 = scmp.lt.u32.totalorder %s2198_s1, %s2907_s20 }
 0x7f2   : > { %p2200_p7 = pnand %p2199_p4, %p2393_p5 }
 0x7f3   : > { %p2205_p11 = por %p2204_p10, %p2203_p9 }
 0x7f4   : > { %p2201_p8 = pneg %p2200_p7 }
 0x7f5   : > { %p2207_p13 = por %p2206_p12, %p2205_p11 }
 0x7f7   : > { %p2208_p0 = pnand %p2207_p13, %p2201_p8 }
 0x7f9   : > { %2211 = shalt.err (!%p2208_p0)
}
 0x7fa   : > { %s2258_s23 = smov 128   ;;  %s2259_s6 = smov 8  }
 0x7fb   : > { %2134 = dma.vmem_to_hbm [thread:$0]  (%p2393_p5), %s2902_s7, 256, %s2907_s20, %s2911_s25, %s2258_s23, %s2258_s23, %s2259_s6  }
 0x7fc PF: > { %s3022_s27 = sld [smem:[#allocation10_spill]]  ;;  %s3023_s30 = sld [smem:[#allocation8_spill]] }
 0x802   : > { %p2140_p1 = scmp.ge.s32.totalorder %s3022_s27, 2  ;;  %s1790_s5 = sand.u32 1, %s3023_s30  }
 0x803   : > { %s1791_s0 = scalar_lea.sflag [#allocation6], %s1790_s5 }
 0x804   : > { %p2137_p2 = pnand %p2140_p1, %p2397_p6 }
 0x806   : > { %2229 = dma.done.wait (!%p2137_p2), %s1791_s0, 256  }
 0x807   : > { %2231 = vsyncadd (!%p2137_p2), %s1791_s0, 4294967040  ;;  %s3025_s30 = sld [smem:[#allocation11_spill]]  ;;  %s3026_s24 = sld [smem:[#allocation9_spill]] }
 0x808   : > { %s3027_s29 = sld [smem:[#allocation12_spill]]  ;;  %s3028_s27 = smov %s2238_s28 }
 0x80d   : > { %p28_p3 = scmp.ge.s32.totalorder %s3025_s30, 4   ;;  %s3029_s28 = smov %s3026_s24 }
 0x80f   :  { %30 = sbr.rel (!%p28_p3) target bundleno = 12 (0xc), region = 127 }
 0x816   :  { %1796 = vsyncpa [#allocation6], 1 }
 0x817   :  { %1798 = vsyncpa [#allocation6 + $0x1], 1 }

</bundles_post_ra>
